<compile_context>
chip_gen: v7x
topology: tpu7x:2x2x1
jax: 0.10.0
libtpu: 0.0.40
codegen_flags: <defaults>
</compile_context>

<pallas_src>
import jax
import jax.numpy as jnp
from jax.experimental import pallas as pl
from jax.experimental.pallas import tpu as pltpu

# Layer widths of the autoencoder.
DIMS = [28 * 28, 128, 64, 12, 3, 12, 64, 128, 28 * 28]

D_IN = 28 * 28   # 784 : true (unpadded) feature width
H_PAD = 128      # padded hidden width (lane-dense)


def _cdiv(a, b):
    return (a + b - 1) // b


def _round_up(x, m):
    return _cdiv(x, m) * m


def _pad_to(arr, shape):
    pads = [(0, s - d) for d, s in zip(arr.shape, shape)]
    return jnp.pad(arr, pads)


def _ae_kernel(x_ref,
               w1, b1, w2, b2, w3, b3, w45, b45,
               w6, b6, w7, b7, w8, b8,
               out_ref):
    """Full fused encoder+decoder MLP for one batch tile."""
    h = x_ref[...].astype(jnp.float32)

    def lin(h, w_ref, b_ref):
        w = w_ref[...]
        # Cast LHS to the weight dtype (bf16 by default) so the MXU runs a
        # single native pass; accumulate in f32.
        return jnp.dot(h.astype(w.dtype), w,
                       preferred_element_type=jnp.float32) + b_ref[...]

    h = jnp.maximum(lin(h, w1, b1), 0.0)    # 784 -> 128, ReLU
    h = jnp.maximum(lin(h, w2, b2), 0.0)    # 128 -> 128 (64 live), ReLU
    h = jnp.maximum(lin(h, w3, b3), 0.0)    # 128 -> 128 (12 live), ReLU
    h = jnp.maximum(lin(h, w45, b45), 0.0)  # fused 12->3->12 as 128 -> 128, ReLU
    h = jnp.maximum(lin(h, w6, b6), 0.0)    # 128 -> 128 (64 live), ReLU
    h = jnp.maximum(lin(h, w7, b7), 0.0)    # 128 -> 128, ReLU
    z = lin(h, w8, b8)                      # 128 -> 784
    # Sigmoid via tanh: transcendental goes to the EUP, no VALU divide.
    out_ref[...] = (0.5 * jnp.tanh(0.5 * z) + 0.5).astype(out_ref.dtype)


def prepare_params(params, mm_dtype=jnp.bfloat16):
    """Fuse layers 4&5, zero-pad hidden widths to 128, cast weights for MXU.

    Zero-padding weight rows/cols AND biases is exact: padded output columns
    are 0 before and after ReLU, so they contribute nothing downstream.
    Biases stay f32 (they feed the f32 accumulator / VPU path).
    """
    (w1, b1), (w2, b2), (w3, b3), (w4, b4), (w5, b5), (w6, b6), (w7, b7), (w8, b8) = params
    # Fuse 12->3 (no activation) and 3->12 into a single 12->12 affine layer.
    w45 = w4 @ w5
    b45 = b4 @ w5 + b5

    def prep_w(w, shape):
        return _pad_to(w, shape).astype(mm_dtype)

    def prep_b(b, shape):
        return _pad_to(b, shape).astype(jnp.float32)

    return [
        (prep_w(w1, (D_IN, H_PAD)),   prep_b(b1, (1, H_PAD))),
        (prep_w(w2, (H_PAD, H_PAD)),  prep_b(b2, (1, H_PAD))),
        (prep_w(w3, (H_PAD, H_PAD)),  prep_b(b3, (1, H_PAD))),
        (prep_w(w45, (H_PAD, H_PAD)), prep_b(b45, (1, H_PAD))),
        (prep_w(w6, (H_PAD, H_PAD)),  prep_b(b6, (1, H_PAD))),
        (prep_w(w7, (H_PAD, H_PAD)),  prep_b(b7, (1, H_PAD))),
        (prep_w(w8, (H_PAD, D_IN)),   prep_b(b8, (1, D_IN))),
    ]


def autoencoder_forward(x, params, *, tb=256, mm_dtype=jnp.bfloat16):
    """x: (B, 784) float32; params: list of 8 (W_(in,out), b_(1,out)) tuples.

    tb: max batch tile. 256 is safe under v5e's 16 MiB scoped-VMEM default;
        512 is better on v6e/v7x (still >=2 grid steps for large B so the
        'parallel' batch axis keeps both v7x TensorCores busy).
    mm_dtype: matmul operand dtype (bf16 default; pass jnp.float32 for a
        full-precision run).
    """
    B, D = x.shape
    assert D == D_IN

    prepared = prepare_params(params, mm_dtype)

    # Balanced batch tiling: at most 7 padded rows per tile for any B.
    num_tiles = max(1, _cdiv(B, tb))
    tb_eff = _round_up(_cdiv(B, num_tiles), 8)
    b_pad = num_tiles * tb_eff
    x_in = x if b_pad == B else jnp.pad(x, ((0, b_pad - B), (0, 0)))

    flat_params = []
    param_specs = []
    for w, b in prepared:
        flat_params += [w, b]
        # Constant block index -> resident across all grid steps (no re-DMA).
        param_specs.append(pl.BlockSpec(w.shape, lambda i: (0, 0)))
        param_specs.append(pl.BlockSpec(b.shape, lambda i: (0, 0)))

    weight_bytes = sum(int(v.size) * v.dtype.itemsize for v in flat_params)
    flops = 2 * b_pad * (D_IN * H_PAD + 5 * H_PAD * H_PAD + H_PAD * D_IN)
    cost = pl.CostEstimate(
        flops=flops,
        transcendentals=b_pad * D_IN,
        bytes_accessed=2 * b_pad * D_IN * x.dtype.itemsize + weight_bytes,
    )

    out_p = pl.pallas_call(
        _ae_kernel,
        out_shape=jax.ShapeDtypeStruct((b_pad, D_IN), x.dtype),
        grid_spec=pltpu.PrefetchScalarGridSpec(
            num_scalar_prefetch=0,
            grid=(num_tiles,),
            in_specs=[pl.BlockSpec((tb_eff, D_IN), lambda i: (i, 0))] + param_specs,
            out_specs=pl.BlockSpec((tb_eff, D_IN), lambda i: (i, 0)),
        ),
        compiler_params=pltpu.CompilerParams(
            dimension_semantics=("parallel",)),
        cost_estimate=cost,
    )(x_in, *flat_params)

    return out_p if b_pad == B else out_p[:B]


def init_params(key):
    """Deterministic PyTorch-style init: U(-1/sqrt(fan_in), 1/sqrt(fan_in))."""
    params = []
    for fan_in, fan_out in zip(DIMS[:-1], DIMS[1:]):
        key, kw, kb = jax.random.split(key, 3)
        bound = 1.0 / jnp.sqrt(float(fan_in))
        w = jax.random.uniform(kw, (fan_in, fan_out), jnp.float32, -bound, bound)
        b = jax.random.uniform(kb, (1, fan_out), jnp.float32, -bound, bound)
        params.append((w, b))
    return params


def reference_forward(x, params):
    """Pure-JAX reference (unfused, unpadded, high-precision matmuls)."""
    h = x
    n = len(params)
    for idx, (w, b) in enumerate(params):
        h = jnp.dot(h, w, precision=jax.lax.Precision.HIGHEST) + b
        if idx == n - 1:
            h = jax.nn.sigmoid(h)
        elif idx != 3:  # the 12->3 bottleneck layer has no activation
            h = jnp.maximum(h, 0.0)
    return h


if __name__ == "__main__":
    key = jax.random.PRNGKey(0)
    key, kx = jax.random.split(key)

    B = 64
    x = jax.random.uniform(kx, (B, D_IN), jnp.float32)  # pixel-like inputs in [0,1)
    params = init_params(key)

    ref = reference_forward(x, params)

    # Default bf16-MXU path; tb=32 -> 2 pipelined grid steps at B=64.
    out = jax.block_until_ready(autoencoder_forward(x, params, tb=32))
    assert out.shape == (B, D_IN)
    assert jnp.allclose(out, ref, atol=3e-2), float(jnp.max(jnp.abs(out - ref)))

    # f32-MXU path: checks padding / layer-4&5 fusion exactness more tightly.
    out_f32 = jax.block_until_ready(
        autoencoder_forward(x, params, tb=32, mm_dtype=jnp.float32))
    assert jnp.allclose(out_f32, ref, atol=1e-2), float(jnp.max(jnp.abs(out_f32 - ref)))

    # Non-multiple batch -> balanced-tile + minimal row padding/slicing path.
    x_small = x[:5]
    out_small = jax.block_until_ready(autoencoder_forward(x_small, params))
    assert out_small.shape == (5, D_IN)
    assert jnp.allclose(out_small, ref[:5], atol=3e-2)

    print("KERNEL_OK")
</pallas_src>

<mosaic_0001>
module attributes {stable_mosaic.version = 11 : i64} {
  func.func @_ae_kernel(%arg0: i32, %arg1: memref<32x784xf32, #tpu.memory_space<vmem>>, %arg2: memref<784x128xbf16, #tpu.memory_space<vmem>>, %arg3: memref<1x128xf32, #tpu.memory_space<vmem>>, %arg4: memref<128x128xbf16, #tpu.memory_space<vmem>>, %arg5: memref<1x128xf32, #tpu.memory_space<vmem>>, %arg6: memref<128x128xbf16, #tpu.memory_space<vmem>>, %arg7: memref<1x128xf32, #tpu.memory_space<vmem>>, %arg8: memref<128x128xbf16, #tpu.memory_space<vmem>>, %arg9: memref<1x128xf32, #tpu.memory_space<vmem>>, %arg10: memref<128x128xbf16, #tpu.memory_space<vmem>>, %arg11: memref<1x128xf32, #tpu.memory_space<vmem>>, %arg12: memref<128x128xbf16, #tpu.memory_space<vmem>>, %arg13: memref<1x128xf32, #tpu.memory_space<vmem>>, %arg14: memref<128x784xbf16, #tpu.memory_space<vmem>>, %arg15: memref<1x784xf32, #tpu.memory_space<vmem>>, %arg16: memref<32x784xf32, #tpu.memory_space<vmem>>) attributes {dimension_semantics = [#tpu.dimension_semantics<parallel>], iteration_bounds = array<i64: 2>, scalar_prefetch = 0 : i64, scratch_operands = 0 : i64, tpu.core_type = #tpu.core_type<tc>, window_params = [{transform_indices = @transform_0, window_bounds = array<i64: 32, 784>}, {pipeline_mode = #tpu.pipeline_mode<synchronous>, transform_indices = @transform_1, window_bounds = array<i64: 784, 128>}, {pipeline_mode = #tpu.pipeline_mode<synchronous>, transform_indices = @transform_2, window_bounds = array<i64: 1, 128>}, {pipeline_mode = #tpu.pipeline_mode<synchronous>, transform_indices = @transform_3, window_bounds = array<i64: 128, 128>}, {pipeline_mode = #tpu.pipeline_mode<synchronous>, transform_indices = @transform_4, window_bounds = array<i64: 1, 128>}, {pipeline_mode = #tpu.pipeline_mode<synchronous>, transform_indices = @transform_5, window_bounds = array<i64: 128, 128>}, {pipeline_mode = #tpu.pipeline_mode<synchronous>, transform_indices = @transform_6, window_bounds = array<i64: 1, 128>}, {pipeline_mode = #tpu.pipeline_mode<synchronous>, transform_indices = @transform_7, window_bounds = array<i64: 128, 128>}, {pipeline_mode = #tpu.pipeline_mode<synchronous>, transform_indices = @transform_8, window_bounds = array<i64: 1, 128>}, {pipeline_mode = #tpu.pipeline_mode<synchronous>, transform_indices = @transform_9, window_bounds = array<i64: 128, 128>}, {pipeline_mode = #tpu.pipeline_mode<synchronous>, transform_indices = @transform_10, window_bounds = array<i64: 1, 128>}, {pipeline_mode = #tpu.pipeline_mode<synchronous>, transform_indices = @transform_11, window_bounds = array<i64: 128, 128>}, {pipeline_mode = #tpu.pipeline_mode<synchronous>, transform_indices = @transform_12, window_bounds = array<i64: 1, 128>}, {pipeline_mode = #tpu.pipeline_mode<synchronous>, transform_indices = @transform_13, window_bounds = array<i64: 128, 784>}, {pipeline_mode = #tpu.pipeline_mode<synchronous>, transform_indices = @transform_14, window_bounds = array<i64: 1, 784>}, {transform_indices = @transform_15, window_bounds = array<i64: 32, 784>}]} {
    %c0 = arith.constant 0 : index
    %c0_0 = arith.constant 0 : index
    %0 = vector.load %arg1[%c0, %c0_0] : memref<32x784xf32, #tpu.memory_space<vmem>>, vector<32x784xf32>
    %c0_1 = arith.constant 0 : index
    %c0_2 = arith.constant 0 : index
    %1 = vector.load %arg2[%c0_1, %c0_2] : memref<784x128xbf16, #tpu.memory_space<vmem>>, vector<784x128xbf16>
    %2 = arith.truncf %0 : vector<32x784xf32> to vector<32x784xbf16>
    %cst = arith.constant dense<0.000000e+00> : vector<32x128xf32>
    %3 = tpu.matmul %2, %1, %cst {dimension_numbers = #tpu.dot_dimension_numbers<[1], [0], [0], [1], [0, 0, 1, 1], [], []>} : vector<32x784xbf16>, vector<784x128xbf16>, vector<32x128xf32> -> vector<32x128xf32>
    %c0_3 = arith.constant 0 : index
    %c0_4 = arith.constant 0 : index
    %4 = vector.load %arg3[%c0_3, %c0_4] : memref<1x128xf32, #tpu.memory_space<vmem>>, vector<1x128xf32>
    %5 = vector.broadcast %4 : vector<1x128xf32> to vector<32x128xf32>
    %6 = arith.addf %3, %5 : vector<32x128xf32>
    %cst_5 = arith.constant 0.000000e+00 : f32
    %7 = vector.broadcast %cst_5 : f32 to vector<32x128xf32>
    %8 = arith.maximumf %6, %7 : vector<32x128xf32>
    %c0_6 = arith.constant 0 : index
    %c0_7 = arith.constant 0 : index
    %9 = vector.load %arg4[%c0_6, %c0_7] : memref<128x128xbf16, #tpu.memory_space<vmem>>, vector<128x128xbf16>
    %10 = arith.truncf %8 : vector<32x128xf32> to vector<32x128xbf16>
    %cst_8 = arith.constant dense<0.000000e+00> : vector<32x128xf32>
    %11 = tpu.matmul %10, %9, %cst_8 {dimension_numbers = #tpu.dot_dimension_numbers<[1], [0], [0], [1], [0, 0, 1, 1], [], []>} : vector<32x128xbf16>, vector<128x128xbf16>, vector<32x128xf32> -> vector<32x128xf32>
    %c0_9 = arith.constant 0 : index
    %c0_10 = arith.constant 0 : index
    %12 = vector.load %arg5[%c0_9, %c0_10] : memref<1x128xf32, #tpu.memory_space<vmem>>, vector<1x128xf32>
    %13 = vector.broadcast %12 : vector<1x128xf32> to vector<32x128xf32>
    %14 = arith.addf %11, %13 : vector<32x128xf32>
    %cst_11 = arith.constant 0.000000e+00 : f32
    %15 = vector.broadcast %cst_11 : f32 to vector<32x128xf32>
    %16 = arith.maximumf %14, %15 : vector<32x128xf32>
    %c0_12 = arith.constant 0 : index
    %c0_13 = arith.constant 0 : index
    %17 = vector.load %arg6[%c0_12, %c0_13] : memref<128x128xbf16, #tpu.memory_space<vmem>>, vector<128x128xbf16>
    %18 = arith.truncf %16 : vector<32x128xf32> to vector<32x128xbf16>
    %cst_14 = arith.constant dense<0.000000e+00> : vector<32x128xf32>
    %19 = tpu.matmul %18, %17, %cst_14 {dimension_numbers = #tpu.dot_dimension_numbers<[1], [0], [0], [1], [0, 0, 1, 1], [], []>} : vector<32x128xbf16>, vector<128x128xbf16>, vector<32x128xf32> -> vector<32x128xf32>
    %c0_15 = arith.constant 0 : index
    %c0_16 = arith.constant 0 : index
    %20 = vector.load %arg7[%c0_15, %c0_16] : memref<1x128xf32, #tpu.memory_space<vmem>>, vector<1x128xf32>
    %21 = vector.broadcast %20 : vector<1x128xf32> to vector<32x128xf32>
    %22 = arith.addf %19, %21 : vector<32x128xf32>
    %cst_17 = arith.constant 0.000000e+00 : f32
    %23 = vector.broadcast %cst_17 : f32 to vector<32x128xf32>
    %24 = arith.maximumf %22, %23 : vector<32x128xf32>
    %c0_18 = arith.constant 0 : index
    %c0_19 = arith.constant 0 : index
    %25 = vector.load %arg8[%c0_18, %c0_19] : memref<128x128xbf16, #tpu.memory_space<vmem>>, vector<128x128xbf16>
    %26 = arith.truncf %24 : vector<32x128xf32> to vector<32x128xbf16>
    %cst_20 = arith.constant dense<0.000000e+00> : vector<32x128xf32>
    %27 = tpu.matmul %26, %25, %cst_20 {dimension_numbers = #tpu.dot_dimension_numbers<[1], [0], [0], [1], [0, 0, 1, 1], [], []>} : vector<32x128xbf16>, vector<128x128xbf16>, vector<32x128xf32> -> vector<32x128xf32>
    %c0_21 = arith.constant 0 : index
    %c0_22 = arith.constant 0 : index
    %28 = vector.load %arg9[%c0_21, %c0_22] : memref<1x128xf32, #tpu.memory_space<vmem>>, vector<1x128xf32>
    %29 = vector.broadcast %28 : vector<1x128xf32> to vector<32x128xf32>
    %30 = arith.addf %27, %29 : vector<32x128xf32>
    %cst_23 = arith.constant 0.000000e+00 : f32
    %31 = vector.broadcast %cst_23 : f32 to vector<32x128xf32>
    %32 = arith.maximumf %30, %31 : vector<32x128xf32>
    %c0_24 = arith.constant 0 : index
    %c0_25 = arith.constant 0 : index
    %33 = vector.load %arg10[%c0_24, %c0_25] : memref<128x128xbf16, #tpu.memory_space<vmem>>, vector<128x128xbf16>
    %34 = arith.truncf %32 : vector<32x128xf32> to vector<32x128xbf16>
    %cst_26 = arith.constant dense<0.000000e+00> : vector<32x128xf32>
    %35 = tpu.matmul %34, %33, %cst_26 {dimension_numbers = #tpu.dot_dimension_numbers<[1], [0], [0], [1], [0, 0, 1, 1], [], []>} : vector<32x128xbf16>, vector<128x128xbf16>, vector<32x128xf32> -> vector<32x128xf32>
    %c0_27 = arith.constant 0 : index
    %c0_28 = arith.constant 0 : index
    %36 = vector.load %arg11[%c0_27, %c0_28] : memref<1x128xf32, #tpu.memory_space<vmem>>, vector<1x128xf32>
    %37 = vector.broadcast %36 : vector<1x128xf32> to vector<32x128xf32>
    %38 = arith.addf %35, %37 : vector<32x128xf32>
    %cst_29 = arith.constant 0.000000e+00 : f32
    %39 = vector.broadcast %cst_29 : f32 to vector<32x128xf32>
    %40 = arith.maximumf %38, %39 : vector<32x128xf32>
    %c0_30 = arith.constant 0 : index
    %c0_31 = arith.constant 0 : index
    %41 = vector.load %arg12[%c0_30, %c0_31] : memref<128x128xbf16, #tpu.memory_space<vmem>>, vector<128x128xbf16>
    %42 = arith.truncf %40 : vector<32x128xf32> to vector<32x128xbf16>
    %cst_32 = arith.constant dense<0.000000e+00> : vector<32x128xf32>
    %43 = tpu.matmul %42, %41, %cst_32 {dimension_numbers = #tpu.dot_dimension_numbers<[1], [0], [0], [1], [0, 0, 1, 1], [], []>} : vector<32x128xbf16>, vector<128x128xbf16>, vector<32x128xf32> -> vector<32x128xf32>
    %c0_33 = arith.constant 0 : index
    %c0_34 = arith.constant 0 : index
    %44 = vector.load %arg13[%c0_33, %c0_34] : memref<1x128xf32, #tpu.memory_space<vmem>>, vector<1x128xf32>
    %45 = vector.broadcast %44 : vector<1x128xf32> to vector<32x128xf32>
    %46 = arith.addf %43, %45 : vector<32x128xf32>
    %cst_35 = arith.constant 0.000000e+00 : f32
    %47 = vector.broadcast %cst_35 : f32 to vector<32x128xf32>
    %48 = arith.maximumf %46, %47 : vector<32x128xf32>
    %c0_36 = arith.constant 0 : index
    %c0_37 = arith.constant 0 : index
    %49 = vector.load %arg14[%c0_36, %c0_37] : memref<128x784xbf16, #tpu.memory_space<vmem>>, vector<128x784xbf16>
    %50 = arith.truncf %48 : vector<32x128xf32> to vector<32x128xbf16>
    %cst_38 = arith.constant dense<0.000000e+00> : vector<32x784xf32>
    %51 = tpu.matmul %50, %49, %cst_38 {dimension_numbers = #tpu.dot_dimension_numbers<[1], [0], [0], [1], [0, 0, 1, 1], [], []>} : vector<32x128xbf16>, vector<128x784xbf16>, vector<32x784xf32> -> vector<32x784xf32>
    %c0_39 = arith.constant 0 : index
    %c0_40 = arith.constant 0 : index
    %52 = vector.load %arg15[%c0_39, %c0_40] : memref<1x784xf32, #tpu.memory_space<vmem>>, vector<1x784xf32>
    %53 = vector.broadcast %52 : vector<1x784xf32> to vector<32x784xf32>
    %54 = arith.addf %51, %53 : vector<32x784xf32>
    %cst_41 = arith.constant 5.000000e-01 : f32
    %55 = vector.broadcast %cst_41 : f32 to vector<32x784xf32>
    %56 = arith.mulf %55, %54 : vector<32x784xf32>
    %57 = math.tanh %56 : vector<32x784xf32>
    %cst_42 = arith.constant 5.000000e-01 : f32
    %58 = vector.broadcast %cst_42 : f32 to vector<32x784xf32>
    %59 = arith.mulf %58, %57 : vector<32x784xf32>
    %cst_43 = arith.constant 5.000000e-01 : f32
    %60 = vector.broadcast %cst_43 : f32 to vector<32x784xf32>
    %61 = arith.addf %59, %60 : vector<32x784xf32>
    %c0_44 = arith.constant 0 : index
    %c0_45 = arith.constant 0 : index
    %62 = vector.load %arg16[%c0_44, %c0_45] : memref<32x784xf32, #tpu.memory_space<vmem>>, vector<32x784xf32>
    tpu.vector_store %arg16[%c0_44, %c0_45], %61 {strides = array<i32>} : memref<32x784xf32, #tpu.memory_space<vmem>>, vector<32x784xf32>,
    return
  }
  func.func @transform_0(%arg0: i32) -> (i32, i32) {
    %c0_i32 = arith.constant 0 : i32
    %c0_i32_0 = arith.constant 0 : i32
    return %arg0, %c0_i32 : i32, i32
  }
  func.func @transform_1(%arg0: i32) -> (i32, i32) {
    %c0_i32 = arith.constant 0 : i32
    %c0_i32_0 = arith.constant 0 : i32
    %c0_i32_1 = arith.constant 0 : i32
    return %c0_i32, %c0_i32_0 : i32, i32
  }
  func.func @transform_2(%arg0: i32) -> (i32, i32) {
    %c0_i32 = arith.constant 0 : i32
    %c0_i32_0 = arith.constant 0 : i32
    %c0_i32_1 = arith.constant 0 : i32
    return %c0_i32, %c0_i32_0 : i32, i32
  }
  func.func @transform_3(%arg0: i32) -> (i32, i32) {
    %c0_i32 = arith.constant 0 : i32
    %c0_i32_0 = arith.constant 0 : i32
    %c0_i32_1 = arith.constant 0 : i32
    return %c0_i32, %c0_i32_0 : i32, i32
  }
  func.func @transform_4(%arg0: i32) -> (i32, i32) {
    %c0_i32 = arith.constant 0 : i32
    %c0_i32_0 = arith.constant 0 : i32
    %c0_i32_1 = arith.constant 0 : i32
    return %c0_i32, %c0_i32_0 : i32, i32
  }
  func.func @transform_5(%arg0: i32) -> (i32, i32) {
    %c0_i32 = arith.constant 0 : i32
    %c0_i32_0 = arith.constant 0 : i32
    %c0_i32_1 = arith.constant 0 : i32
    return %c0_i32, %c0_i32_0 : i32, i32
  }
  func.func @transform_6(%arg0: i32) -> (i32, i32) {
    %c0_i32 = arith.constant 0 : i32
    %c0_i32_0 = arith.constant 0 : i32
    %c0_i32_1 = arith.constant 0 : i32
    return %c0_i32, %c0_i32_0 : i32, i32
  }
  func.func @transform_7(%arg0: i32) -> (i32, i32) {
    %c0_i32 = arith.constant 0 : i32
    %c0_i32_0 = arith.constant 0 : i32
    %c0_i32_1 = arith.constant 0 : i32
    return %c0_i32, %c0_i32_0 : i32, i32
  }
  func.func @transform_8(%arg0: i32) -> (i32, i32) {
    %c0_i32 = arith.constant 0 : i32
    %c0_i32_0 = arith.constant 0 : i32
    %c0_i32_1 = arith.constant 0 : i32
    return %c0_i32, %c0_i32_0 : i32, i32
  }
  func.func @transform_9(%arg0: i32) -> (i32, i32) {
    %c0_i32 = arith.constant 0 : i32
    %c0_i32_0 = arith.constant 0 : i32
    %c0_i32_1 = arith.constant 0 : i32
    return %c0_i32, %c0_i32_0 : i32, i32
  }
  func.func @transform_10(%arg0: i32) -> (i32, i32) {
    %c0_i32 = arith.constant 0 : i32
    %c0_i32_0 = arith.constant 0 : i32
    %c0_i32_1 = arith.constant 0 : i32
    return %c0_i32, %c0_i32_0 : i32, i32
  }
  func.func @transform_11(%arg0: i32) -> (i32, i32) {
    %c0_i32 = arith.constant 0 : i32
    %c0_i32_0 = arith.constant 0 : i32
    %c0_i32_1 = arith.constant 0 : i32
    return %c0_i32, %c0_i32_0 : i32, i32
  }
  func.func @transform_12(%arg0: i32) -> (i32, i32) {
    %c0_i32 = arith.constant 0 : i32
    %c0_i32_0 = arith.constant 0 : i32
    %c0_i32_1 = arith.constant 0 : i32
    return %c0_i32, %c0_i32_0 : i32, i32
  }
  func.func @transform_13(%arg0: i32) -> (i32, i32) {
    %c0_i32 = arith.constant 0 : i32
    %c0_i32_0 = arith.constant 0 : i32
    %c0_i32_1 = arith.constant 0 : i32
    return %c0_i32, %c0_i32_0 : i32, i32
  }
  func.func @transform_14(%arg0: i32) -> (i32, i32) {
    %c0_i32 = arith.constant 0 : i32
    %c0_i32_0 = arith.constant 0 : i32
    %c0_i32_1 = arith.constant 0 : i32
    return %c0_i32, %c0_i32_0 : i32, i32
  }
  func.func @transform_15(%arg0: i32) -> (i32, i32) {
    %c0_i32 = arith.constant 0 : i32
    %c0_i32_0 = arith.constant 0 : i32
    return %arg0, %c0_i32 : i32, i32
  }
}

</mosaic_0001>

<bundles_post_ra>
// kernel: tpu_custom_call.1
= control target key start
LH: loop header
LB: loop body
LE: loop exit
PB: predicated region body
PF: predicated region fallthrough
CT: control target
= control target key end

     0   :  { %s4575_s0 = inlined_call_operand.vmem [shape: f32[64,784], index: 0, kind: input, shape index: {}]   ;;  %s4576_s1 = inlined_call_operand.vmem [shape: bf16[784,128], index: 1, kind: input, shape index: {}]   ;;  %s4577_s2 = inlined_call_operand.hbm [shape: f32[1,128], index: 2, kind: input, shape index: {}]   ;;  %s4578_s3 = inlined_call_operand.hbm [shape: bf16[128,128], index: 3, kind: input, shape index: {}]   ;;  %s4579_s4 = inlined_call_operand.vmem [shape: f32[1,128], index: 4, kind: input, shape index: {}]   ;;  %s4580_s5 = inlined_call_operand.hbm [shape: bf16[128,128], index: 5, kind: input, shape index: {}]   ;;  %s4581_s6 = inlined_call_operand.vmem [shape: f32[1,128], index: 6, kind: input, shape index: {}]   ;;  %s4582_s7 = inlined_call_operand.hbm [shape: bf16[128,128], index: 7, kind: input, shape index: {}]   ;;  %s4583_s8 = inlined_call_operand.vmem [shape: f32[1,128], index: 8, kind: input, shape index: {}]   ;;  %s4584_s9 = inlined_call_operand.hbm [shape: bf16[128,128], index: 9, kind: input, shape index: {}]   ;;  %s4585_s10 = inlined_call_operand.vmem [shape: f32[1,128], index: 10, kind: input, shape index: {}]   ;;  %s4586_s11 = inlined_call_operand.hbm [shape: bf16[128,128], index: 11, kind: input, shape index: {}]   ;;  %s4587_s12 = inlined_call_operand.vmem [shape: f32[1,128], index: 12, kind: input, shape index: {}]   ;;  %s4588_s13 = inlined_call_operand.vmem [shape: bf16[128,784], index: 13, kind: input, shape index: {}]   ;;  %s4589_s14 = inlined_call_operand.vmem [shape: f32[1,784], index: 14, kind: input, shape index: {}]   ;;  %s4590_s15 = inlined_call_operand.hbm [shape: f32[64,784], index: 15, kind: output, shape index: {}]  }
   0x1   :  { %4607 = sst [smem:[#allocation27_spill]] %s4587_s12 }
   0x2   :  { %4608 = sst [smem:[#allocation28_spill]] %s4589_s14 }
   0x3   :  { %4609 = sst [smem:[#allocation29_spill]] %s4590_s15 }
   0x4   :  { %20 = vsyncpa [#allocation3], 0 }
   0x5   :  { %21 = vsyncpa [#allocation6], 0 }
   0x6   :  { %22 = vsyncpa [#allocation9], 0 }
   0x7   :  { %23 = vsyncpa [#allocation12], 0 }
   0x8   :  { %24 = vsyncpa [#allocation4], 0 }
   0x9   :  { %26 = vsyncpa [#allocation4 + $0x1], 0  ;;  %s3862_s18 = smov 0   ;;  %s3864_s19 = smov 0  }
   0xa   :  { %s3866_s20 = smov 0   ;;  %s3868_s21 = smov 0  }
   0xb LB: > { %4610 = sst [smem:[#allocation19_spill]] %s3756_s18  ;;  %s3883_s22 = sadd.s32 4294967295, %s3768_s21   ;;  %s3768_s21 = sphi %s3868_s21, %s4643_s21   ;;  %s3764_s20 = sphi %s3866_s20, %s4646_s20   ;;  %s3760_s19 = sphi %s3864_s19, %s4645_s19   ;;  %s3756_s18 = sphi %s3862_s18, %s4644_s18  }
   0xc   : > { %4611 = sst [smem:[#allocation20_spill]] %s3760_s19  ;;  %s2740_s23 = sadd.s32 4294967294, %s3768_s21  }
   0xd   : > { %4612 = sst [smem:[#allocation21_spill]] %s3764_s20  ;;  %s3887_s24 = sadd.s32 1, %s3768_s21  }
   0xe   : > { %4613 = sst [smem:[#allocation22_spill]] %s3768_s21  ;;  %s359_s25 = sadd.s32 1, %s3764_s20 }
   0xf   : > { %4614 = sst [smem:[#allocation23_spill]] %s3887_s24  ;;  %s356_s26 = ssub.s32 %s3768_s21, %s3887_s24 }
  0x10   : > { %p369_p0 = scmp.ne.s32.totalorder %s3764_s20, %s3760_s19  ;;  %p357_p1 = scmp.eq.s32.totalorder %s356_s26, 0 }
  0x11   : > { %p370_p2 = scmp.eq.s32.totalorder %s3883_s22, 1  ;;  %p375_p3 = scmp.ne.s32.totalorder %s3760_s19, %s3756_s18 }
  0x12   : > { %p376_p4 = scmp.eq.s32.totalorder %s2740_s23, 1  ;;  %p2741_p7 = scmp.ge.s32.totalorder %s3768_s21, 1 }
  0x13   : > { %s3898_s27 = scalar_select %p357_p1, %s3764_s20, %s359_s25  }
  0x14   : > { %p3900_p5 = por %p370_p2, %p369_p0  ;;  %p3904_p6 = por %p376_p4, %p375_p3 }
  0x15   : > { %4615 = sst [smem:[#allocation24_spill]] %s3898_s27  ;;  %p383_p8 = scmp.lt.s32.totalorder %s3768_s21, 3 }
  0x16   : > { %s4616_s28 = scalar_select %p3900_p5, 1, 0 }
  0x17   : > { %s4618_s29 = scalar_select %p3904_p6, 1, 0 }
  0x18   : > { %4617 = sst [smem:[#allocation25_spill]] %s4616_s28  ;;  %p4598_p9 = scmp.eq.s32.totalorder %s3883_s22, 0 }
  0x19   : > { %4619 = sst [smem:[#allocation26_spill]] %s4618_s29  ;;  %p3911_p10 = pnand %p2741_p7, %p383_p8 }
  0x1a   : > { %s3770_s16 = smov [#allocation5]   ;;  %s3771_s25 = smov [#allocation8]  }
  0x1b   : > { %s4620_s30 = scalar_select %p3911_p10, 1, 0 }
  0x1c   : > { %s409_s17 = sshll.u32 %s3770_s16, 4  ;;  %p3218_p11 = pneg %p3911_p10  ;;  %s3917_s17 = int_to_ptr.vmem [resolvable:$true] %s409_s17 }
  0x1d   : > { %s441_s26 = sshll.u32 %s3771_s25, 4  ;;  %s3772_s27 = smov [#allocation2]   ;;  %s3925_s26 = int_to_ptr.vmem [resolvable:$true] %s441_s26 }
  0x1e   : > { %p3921_p12 = pnand %p4598_p9, %p3218_p11  ;;  %s3927_s20 = sshll.u32 %s3772_s27, 4  ;;  %s400_s20 = int_to_ptr.vmem [resolvable:$true] %s3927_s20 }
  0x1f   : > { %s3522_s16 = scalar_lea.hbm %s4578_s3, 1024 }
  0x20   : > { %p3523_p13 = scmp.ne.s32.totalorder %s4578_s3, %s3522_s16  ;;  %p3937_p0 = pneg %p3921_p12 }
  0x21   : > { %p3529_p3 = scmp.lt.u32.totalorder %s3522_s16, %s4578_s3 }
  0x22   : > { %p3525_p1 = pnand %p3937_p0, %p3523_p13 }
  0x24   : > { %p3526_p2 = pneg %p3525_p1 }
  0x26   : > { %p3531_p4 = pnand %p3529_p3, %p3526_p2 }
  0x28   : > { %3534 = shalt.err (!%p3531_p4)
}
  0x29   : > { %s3535_s18 = scalar_lea.vmem %s3917_s17, 1024  ;;  %p3543_p9 = scmp.lt.s32.totalorder %s3917_s17, %s3917_s17 }
  0x2a   : > { %p3536_p7 = scmp.ne.s32.totalorder %s3917_s17, %s3535_s18  ;;  %p3544_p6 = scmp.lt.s32.totalorder %s3535_s18, %s3535_s18 }
  0x2c   : > { %p3538_p8 = pnand %p3536_p7, %p3937_p0  ;;  %p3545_p13 = por %p3544_p6, %p3543_p9 }
  0x2e   : > { %p3539_p11 = pneg %p3538_p8 }
  0x30   : > { %p3546_p1 = pnand %p3545_p13, %p3539_p11 }
  0x32   : > { %3549 = shalt.err (!%p3546_p1)
}
  0x33   : > { %s4605_s21 = smov 64   ;;  %s3774_s24 = smov 4  }
  0x34   : > { %3224 = dma.hbm_to_vmem [thread:$0]  (!%p3921_p12), %s4578_s3, 1024, %s3917_s17, [#allocation6], %s4605_s21, %s4605_s21, %s3774_s24  }
  0x35   : > { %s3550_s18 = scalar_lea.hbm %s4582_s7, 1024 }
  0x36   : > { %p3551_p6 = scmp.ne.s32.totalorder %s4582_s7, %s3550_s18  ;;  %p3557_p3 = scmp.lt.u32.totalorder %s3550_s18, %s4582_s7 }
  0x38   : > { %p3553_p9 = pnand %p3551_p6, %p3937_p0 }
  0x3a   : > { %p3554_p2 = pneg %p3553_p9 }
  0x3c   : > { %p3559_p4 = pnand %p3557_p3, %p3554_p2 }
  0x3e   : > { %3562 = shalt.err (!%p3559_p4)
}
  0x3f   : > { %s3563_s17 = scalar_lea.vmem %s3925_s26, 1024  ;;  %p3571_p13 = scmp.lt.s32.totalorder %s3925_s26, %s3925_s26 }
  0x40   : > { %p3564_p7 = scmp.ne.s32.totalorder %s3925_s26, %s3563_s17  ;;  %p3572_p1 = scmp.lt.s32.totalorder %s3563_s17, %s3563_s17 }
  0x42   : > { %p3566_p8 = pnand %p3564_p7, %p3937_p0  ;;  %p3573_p6 = por %p3572_p1, %p3571_p13 }
  0x44   : > { %p3567_p11 = pneg %p3566_p8 }
  0x46   : > { %p3574_p9 = pnand %p3573_p6, %p3567_p11 }
  0x48   : > { %3577 = shalt.err (!%p3574_p9)
}
  0x49   : > { %3230 = dma.hbm_to_vmem [thread:$0]  (!%p3921_p12), %s4582_s7, 1024, %s3925_s26, [#allocation9], %s4605_s21, %s4605_s21, %s3774_s24  }
  0x4a   : > { %s3578_s29 = scalar_lea.hbm %s4577_s2, 16 }
  0x4b   : > { %p3579_p2 = scmp.ne.s32.totalorder %s4577_s2, %s3578_s29  ;;  %p3585_p7 = scmp.lt.u32.totalorder %s3578_s29, %s4577_s2 }
  0x4d   : > { %p3581_p3 = pnand %p3579_p2, %p3937_p0 }
  0x4f   : > { %p3582_p4 = pneg %p3581_p3 }
  0x51   : > { %p3587_p8 = pnand %p3585_p7, %p3582_p4 }
  0x53   : > { %3590 = shalt.err (!%p3587_p8)
}
  0x54   : > { %s3591_s17 = scalar_lea.vmem %s400_s20, 16  ;;  %s3598_s26 = scalar_lea.vmem %s400_s20, 32 }
  0x55   : > { %p3592_p11 = scmp.ne.s32.totalorder %s400_s20, %s3591_s17  ;;  %p3599_p6 = scmp.lt.s32.totalorder %s400_s20, %s400_s20 }
  0x56   : > { %p3600_p9 = scmp.lt.s32.totalorder %s3598_s26, %s3591_s17 }
  0x57   : > { %p3594_p13 = pnand %p3592_p11, %p3937_p0 }
  0x58   : > { %p3601_p5 = por %p3600_p9, %p3599_p6 }
  0x59   : > { %p3595_p1 = pneg %p3594_p13 }
  0x5b   : > { %p3602_p10 = pnand %p3601_p5, %p3595_p1 }
  0x5d   : > { %3605 = shalt.err (!%p3602_p10)
}
  0x5e   : > { %3221 = dma.hbm_to_vmem [thread:$0]  (!%p3921_p12), %s4577_s2, 16, %s400_s20, [#allocation3]  }
  0x5f   : > { %s3775_s19 = smov [#allocation7]   ;;  %s3776_s29 = smov [#allocation10]  }
  0x60   : > { %s425_s28 = sshll.u32 %s3775_s19, 4  ;;  %s457_s16 = sshll.u32 %s3776_s29, 4  ;;  %s426_s28 = int_to_ptr.vmem [resolvable:$true] %s425_s28  ;;  %s458_s16 = int_to_ptr.vmem [resolvable:$true] %s457_s16 }
  0x61   : > { %s3606_s18 = scalar_lea.hbm %s4580_s5, 1024 }
  0x62   : > { %p3607_p5 = scmp.ne.s32.totalorder %s4580_s5, %s3606_s18  ;;  %p3613_p3 = scmp.lt.u32.totalorder %s3606_s18, %s4580_s5 }
  0x64   : > { %p3609_p10 = pnand %p3607_p5, %p3937_p0 }
  0x66   : > { %p3610_p2 = pneg %p3609_p10 }
  0x68   : > { %p3615_p4 = pnand %p3613_p3, %p3610_p2 }
  0x6a   : > { %3618 = shalt.err (!%p3615_p4)
}
  0x6b   : > { %s3619_s20 = scalar_lea.vmem %s426_s28, 1024  ;;  %p3627_p13 = scmp.lt.s32.totalorder %s426_s28, %s426_s28 }
  0x6c   : > { %p3620_p7 = scmp.ne.s32.totalorder %s426_s28, %s3619_s20  ;;  %p3628_p1 = scmp.lt.s32.totalorder %s3619_s20, %s3619_s20 }
  0x6e   : > { %p3622_p8 = pnand %p3620_p7, %p3937_p0  ;;  %p3629_p6 = por %p3628_p1, %p3627_p13 }
  0x70   : > { %p3623_p11 = pneg %p3622_p8 }
  0x72   : > { %p3630_p9 = pnand %p3629_p6, %p3623_p11 }
  0x74   : > { %3633 = shalt.err (!%p3630_p9)
}
  0x75   : > { %s4623_s14 = smov 64   ;;  %s3634_s27 = scalar_lea.hbm %s4584_s9, 1024 }
  0x76   : > { %3227 = dma.hbm_to_vmem [thread:$0]  (!%p3921_p12), %s4580_s5, 1024, %s426_s28, [#allocation6], %s4623_s14, %s4623_s14, %s3774_s24  }
  0x77   : > { %p3635_p5 = scmp.ne.s32.totalorder %s4584_s9, %s3634_s27  ;;  %p3641_p3 = scmp.lt.u32.totalorder %s3634_s27, %s4584_s9 }
  0x79   : > { %p3637_p10 = pnand %p3635_p5, %p3937_p0 }
  0x7b   : > { %p3638_p2 = pneg %p3637_p10 }
  0x7d   : > { %p3643_p4 = pnand %p3641_p3, %p3638_p2 }
  0x7f   : > { %3646 = shalt.err (!%p3643_p4)
}
  0x80   : > { %s3647_s20 = scalar_lea.vmem %s458_s16, 1024  ;;  %p3655_p13 = scmp.lt.s32.totalorder %s458_s16, %s458_s16 }
  0x81   : > { %p3648_p7 = scmp.ne.s32.totalorder %s458_s16, %s3647_s20  ;;  %p3656_p1 = scmp.lt.s32.totalorder %s3647_s20, %s3647_s20 }
  0x83   : > { %p3650_p8 = pnand %p3648_p7, %p3937_p0  ;;  %p3657_p6 = por %p3656_p1, %p3655_p13 }
  0x85   : > { %p3651_p11 = pneg %p3650_p8 }
  0x87   : > { %p3658_p9 = pnand %p3657_p6, %p3651_p11 }
  0x89   : > { %3661 = shalt.err (!%p3658_p9)
}
  0x8a   : > { %3233 = dma.hbm_to_vmem [thread:$0]  (!%p3921_p12), %s4584_s9, 1024, %s458_s16, [#allocation9], %s4623_s14, %s4623_s14, %s3774_s24  }
  0x8b   : > { %s3777_s19 = smov [#allocation11]   ;;  %s3662_s18 = scalar_lea.hbm %s4586_s11, 1024 }
  0x8c   : > { %s473_s29 = sshll.u32 %s3777_s19, 4  ;;  %p3663_p5 = scmp.ne.s32.totalorder %s4586_s11, %s3662_s18  ;;  %s474_s29 = int_to_ptr.vmem [resolvable:$true] %s473_s29 }
  0x8d   : > { %p3669_p3 = scmp.lt.u32.totalorder %s3662_s18, %s4586_s11 }
  0x8e   : > { %p3665_p10 = pnand %p3663_p5, %p3937_p0 }
  0x90   : > { %p3666_p2 = pneg %p3665_p10 }
  0x92   : > { %p3671_p4 = pnand %p3669_p3, %p3666_p2 }
  0x94   : > { %3674 = shalt.err (!%p3671_p4)
}
  0x95   : > { %s3675_s16 = scalar_lea.vmem %s474_s29, 1024  ;;  %p3683_p13 = scmp.lt.s32.totalorder %s474_s29, %s474_s29 }
  0x96   : > { %p3676_p7 = scmp.ne.s32.totalorder %s474_s29, %s3675_s16  ;;  %p3684_p1 = scmp.lt.s32.totalorder %s3675_s16, %s3675_s16 }
  0x98   : > { %p3678_p8 = pnand %p3676_p7, %p3937_p0  ;;  %p3685_p6 = por %p3684_p1, %p3683_p13 }
  0x9a   : > { %p3679_p11 = pneg %p3678_p8 }
  0x9c   : > { %p3686_p9 = pnand %p3685_p6, %p3679_p11 }
  0x9e   : > { %3689 = shalt.err (!%p3686_p9)
}
  0x9f   : > { %3236 = dma.hbm_to_vmem [thread:$0]  (!%p3921_p12), %s4586_s11, 1024, %s474_s29, [#allocation12], %s4623_s14, %s4623_s14, %s3774_s24  }
  0xa0   : > { %p4624_p5 = scmp.ne.s32.totalorder %s4620_s30, 0 }
  0xa1   : > { %p4625_p0 = scmp.eq.s32.totalorder (!%p4624_p5), %s3883_s22, 0 }
  0xa2   : > { %508 = sbr.rel (%p4624_p5) target bundleno = 1875 (0x753), region = 80 }
  0xa9   : > { %3735 = dma.done.wait (%p4625_p0), [#allocation3], 16   ;;  %p4626_p10 = pmov %p4625_p0 }
  0xaa   : > { %p4627_p2 = pmov %p4625_p0 }
  0xab   : > { %3737 = vsyncadd (%p4626_p10), [#allocation3], 4294967280 }
  0xac   : > { %3739 = dma.done.wait (%p4627_p2), [#allocation6], 2048   ;;  %p4628_p3 = pmov %p4625_p0 }
  0xad   : > { %p4629_p4 = pmov %p4625_p0 }
  0xae   : > { %3741 = vsyncadd (%p4628_p3), [#allocation6], 4294965248 }
  0xaf   : > { %3743 = dma.done.wait (%p4629_p4), [#allocation9], 2048   ;;  %p4630_p12 = pmov %p4625_p0 }
  0xb0   : > { %p4631_p7 = pmov %p4625_p0 }
  0xb1   : > { %3745 = vsyncadd (%p4630_p12), [#allocation9], 4294965248 }
  0xb2   : > { %3747 = dma.done.wait (%p4631_p7), [#allocation12], 1024   ;;  %p4632_p8 = pmov %p4625_p0 }
  0xb3   : > { %v3297_v0 = vld [vmem:[%s4576_s1 + $0x40] sm:$0xff]   ;;  %v3301_v4 = vld [vmem:[%s4576_s1 + $0x48] sm:$0xff]   ;;  %v3305_v8 = vld [vmem:[%s4576_s1 + $0x50] sm:$0xff]   ;;  %s2756_s26 = sshll.u32 %s3883_s22, 2  ;;  %vm1027_vm0 = vcmask 130048   ;;  %s4633_s16 = sld [smem:[#allocation27_spill]] }
  0xb4   : > { %3749 = vsyncadd (%p4632_p8), [#allocation12], 4294966272  ;;  %v3298_v1 = vld [vmem:[%s4576_s1] sm:$0xff]   ;;  %2916 = vmatprep.subr.bf16.mxu0 %v3297_v0  ;;  %v3302_v5 = vld [vmem:[%s4576_s1 + $0x8] sm:$0xff]   ;;  %p578_p11 = scmp.lt.s32.totalorder %s2756_s26, 7  ;;  %s4634_s18 = sld [smem:[#allocation28_spill]] }
  0xb5   : > { %v3299_v2 = vld [vmem:[%s4576_s1 + $0xc0] sm:$0xff]   ;;  %2917 = vmatpush3.bf16.msra.mxu0 %v3298_v1  ;;  %v3303_v6 = vld [vmem:[%s4576_s1 + $0xc8] sm:$0xff]   ;;  %v3306_v9 = vld [vmem:[%s4576_s1 + $0x10] sm:$0xff]   ;;  %s3191_s28 = smul.u32 3584, %s3883_s22  ;;  %s4636_s15 = sld [smem:[#allocation25_spill]] }
  0xb6   : > { %v3300_v3 = vld [vmem:[%s4576_s1 + $0x80] sm:$0xff]   ;;  %2944 = vmatprep.subr.bf16.mxu1 %v3299_v2  ;;  %2918 = vmatprep.subr.bf16.mxu0 %v3301_v4  ;;  %v3304_v7 = vld [vmem:[%s4576_s1 + $0x88] sm:$0xff]   ;;  %v3307_v10 = vld [vmem:[%s4576_s1 + $0xd0] sm:$0xff]   ;;  %s4648_s26 = smov (!%p578_p11, %s2756_s26), 7  ;;  %s4637_s23 = sld [smem:[#allocation29_spill]] }
  0xb7   : > { %2945 = vmatpush3.bf16.msra.mxu1 %v3300_v3  ;;  %v3308_v11 = vld [vmem:[%s4576_s1 + $0x90] sm:$0xff]   ;;  %v3309_v12 = vld [vmem:[%s4576_s1 + $0x58] sm:$0xff]   ;;  %v3313_v16 = vld [vmem:[%s4576_s1 + $0x60] sm:$0xff]   ;;  %s3190_s30 = smul.u32 56, %s4648_s26  ;;  %s4635_s26 = sld [smem:[#allocation20_spill]] }
  0xb8   : > { %2946 = vmatprep.subr.bf16.mxu1 %v3303_v6  ;;  %v3310_v13 = vld [vmem:[%s4576_s1 + $0x18] sm:$0xff]   ;;  %v3314_v17 = vld [vmem:[%s4576_s1 + $0x20] sm:$0xff]   ;;  %v3317_v20 = vld [vmem:[%s4576_s1 + $0x68] sm:$0xff]   ;;  %s3779_s19 = smov [#allocation13]  }
  0xb9   : > { %2919 = vmatpush3.bf16.msra.mxu0 %v3302_v5  ;;  %v3311_v14 = vld [vmem:[%s4576_s1 + $0xd8] sm:$0xff]   ;;  %v3315_v18 = vld [vmem:[%s4576_s1 + $0xe0] sm:$0xff]   ;;  %v3318_v21 = vld [vmem:[%s4576_s1 + $0x28] sm:$0xff]   ;;  %s4178_s12 = scalar_lea.vmem %s4575_s0, %s3190_s30  ;;  %s3694_s29 = sshll.u32 %s3779_s19, 4  ;;  %s3695_s29 = int_to_ptr.vmem [resolvable:$false] %s3694_s29 }
  0xba   : > { %2920 = vmatprep.subr.bf16.mxu0 %v3305_v8  ;;  %v3312_v15 = vld [vmem:[%s4576_s1 + $0x98] sm:$0xff]   ;;  %v3316_v19 = vld [vmem:[%s4576_s1 + $0xa0] sm:$0xff]   ;;  %v3319_v22 = vld [vmem:[%s4576_s1 + $0xe8] sm:$0xff]   ;;  %s3696_s25 = scalar_lea.vmem %s3695_s29, 7168 }
  0xbb   : > { %2947 = vmatpush3.bf16.msra.mxu1 %v3304_v7  ;;  %v3320_v23 = vld [vmem:[%s4576_s1 + $0xa8] sm:$0xff]   ;;  %v3321_v24 = vld [vmem:[%s4576_s1 + $0x70] sm:$0xff]   ;;  %v3325_v28 = vld [vmem:[%s4576_s1 + $0x78] sm:$0xff]   ;;  %p4638_p1 = scmp.ne.s32.totalorder %s4636_s15, 0 }
  0xbc   : > { %2948 = vmatprep.subr.bf16.mxu1 %v3307_v10  ;;  %v3322_v25 = vld [vmem:[%s4576_s1 + $0x30] sm:$0xff]   ;;  %v3326_v29 = vld [vmem:[%s4576_s1 + $0x38] sm:$0xff]   ;;  %v587_v31 = vld [vmem:[%s4178_s12 + $0x8] sm:$0xff]  ;;  %s4528_s24 = scalar_lea.hbm %s4637_s23, %s3191_s28 }
  0xbd   : > { %2921 = vmatpush3.bf16.msra.mxu0 %v3306_v9  ;;  %v3323_v26 = vld [vmem:[%s4576_s1 + $0xf0] sm:$0xff]   ;;  %v3327_v30 = vld [vmem:[%s4576_s1 + $0xf8] sm:$0xff]   ;;  %v594_v32 = vld [vmem:[%s4178_s12 + $0x40] sm:$0xff]  ;;  %s574_s17 = sand.u32 1, %s4635_s26  }
  0xbe   : > { %2922 = vmatprep.subr.bf16.mxu0 %v3309_v12  ;;  %v3324_v27 = vld [vmem:[%s4576_s1 + $0xb0] sm:$0xff]   ;;  %v713_v33 = vpack.c.bf16 %v594_v32, %v587_v31  ;;  %v3328_v34 = vld [vmem:[%s4576_s1 + $0xb8] sm:$0xff]   ;;  %v586_v35 = vld [vmem:[%s4178_s12] sm:$0xff]  ;;  %s3189_s20 = smul.u32 224, %s574_s17 }
  0xbf   : > { %2949 = vmatpush3.bf16.msra.mxu1 %v3308_v11  ;;  %v593_v36 = vld [vmem:[%s4178_s12 + $0x38] sm:$0xff]  ;;  %v3329_v38 = vld [vmem:[%s4576_s1 + $0x140] sm:$0xff]   ;;  %v596_v40 = vld [vmem:[%s4178_s12 + $0x50] sm:$0xff] }
  0xc0   : > { %2950 = vmatprep.subr.bf16.mxu1 %v3311_v14  ;;  %1066 = vmatprep.mubr.bf16.mxu0 %v713_v33  ;;  %v712_v37 = vpack.c.bf16 %v593_v36, %v586_v35  ;;  %v589_v39 = vld [vmem:[%s4178_s12 + $0x18] sm:$0xff]  ;;  %v3330_v42 = vld [vmem:[%s4576_s1 + $0x100] sm:$0xff]   ;;  %v588_v43 = vld [vmem:[%s4178_s12 + $0x10] sm:$0xff] }
  0xc1   : > { %2923 = vmatpush3.bf16.msra.mxu0 %v3310_v13  ;;  %v715_v41 = vpack.c.bf16 %v596_v40, %v589_v39  ;;  %v595_v44 = vld [vmem:[%s4178_s12 + $0x48] sm:$0xff]  ;;  %v3333_v48 = vld [vmem:[%s4576_s1 + $0x150] sm:$0xff]   ;;  %v3335_v50 = vld [vmem:[%s4576_s1 + $0x158] sm:$0xff]  }
  0xc2   : > { %2924 = vmatprep.subr.bf16.mxu0 %v3313_v16  ;;  %v714_v45 = vpack.c.bf16 %v595_v44, %v588_v43  ;;  %v3331_v46 = vld [vmem:[%s4576_s1 + $0x148] sm:$0xff]   ;;  %v3334_v49 = vld [vmem:[%s4576_s1 + $0x110] sm:$0xff]   ;;  %v3336_v51 = vld [vmem:[%s4576_s1 + $0x118] sm:$0xff]  }
  0xc3   : > { %2951 = vmatpush3.bf16.msra.mxu1 %v3312_v15  ;;  %1115 = vmatprep.mubr.bf16.mxu1 %v715_v41  ;;  %v3332_v47 = vld [vmem:[%s4576_s1 + $0x108] sm:$0xff]   ;;  %v601_v52 = vld [vmem:[%s4178_s12 + $0x78] sm:$0xff]  ;;  %v608_v53 = vld [vmem:[%s4178_s12 + $0xb0] sm:$0xff] }
  0xc4   : > { %2952 = vmatprep.subr.bf16.mxu1 %v3315_v18  ;;  %v3337_v54 = vld [vmem:[%s4576_s1 + $0x160] sm:$0xff]   ;;  %v720_v55 = vpack.c.bf16 %v608_v53, %v601_v52  ;;  %v600_v56 = vld [vmem:[%s4178_s12 + $0x70] sm:$0xff]  ;;  %v607_v57 = vld [vmem:[%s4178_s12 + $0xa8] sm:$0xff] }
  0xc5   : > { %2925 = vmatpush3.bf16.msra.mxu0 %v3314_v17  ;;  %v3338_v58 = vld [vmem:[%s4576_s1 + $0x120] sm:$0xff]   ;;  %v719_v59 = vpack.c.bf16 %v607_v57, %v600_v56  ;;  %v603_v60 = vld [vmem:[%s4178_s12 + $0x88] sm:$0xff]  ;;  %v609_v0 = vld [vmem:[%s4178_s12 + $0xb8] sm:$0xff] }
  0xc6   : > { %2926 = vmatprep.subr.bf16.mxu0 %v3317_v20  ;;  %v610_v61 = vld [vmem:[%s4178_s12 + $0xc0] sm:$0xff]  ;;  %v3339_v1 = vld [vmem:[%s4576_s1 + $0x168] sm:$0xff]   ;;  %v3341_v5 = vld [vmem:[%s4576_s1 + $0x170] sm:$0xff]  }
  0xc7   : > { %2953 = vmatpush3.bf16.msra.mxu1 %v3316_v19  ;;  %v602_v62 = vld [vmem:[%s4178_s12 + $0x80] sm:$0xff]  ;;  %v722_v63 = vpack.c.bf16 %v610_v61, %v603_v60  ;;  %v3340_v4 = vld [vmem:[%s4576_s1 + $0x128] sm:$0xff]   ;;  %v592_v9 = vld [vmem:[%s4178_s12 + $0x30] sm:$0xff] }
  0xc8   : > { %2954 = vmatprep.subr.bf16.mxu1 %v3319_v22  ;;  %v721_v2 = vpack.c.bf16 %v609_v0, %v602_v62  ;;  %v3343_v3 = vld [vmem:[%s4576_s1 + $0x180] sm:$0xff]   ;;  %v591_v6 = vld [vmem:[%s4178_s12 + $0x28] sm:$0xff]  ;;  %v613_v12 = vld [vmem:[%s4178_s12 + $0xd8] sm:$0xff] }
  0xc9   : > { %2927 = vmatpush3.bf16.msra.mxu0 %v3318_v21  ;;  %v598_v7 = vld [vmem:[%s4178_s12 + $0x60] sm:$0xff]  ;;  %v599_v10 = vld [vmem:[%s4178_s12 + $0x68] sm:$0xff]  ;;  %v3342_v13 = vld [vmem:[%s4576_s1 + $0x130] sm:$0xff]  }
  0xca   : > { %2928 = vmatprep.subr.bf16.mxu0 %v3321_v24  ;;  %v717_v8 = vpack.c.bf16 %v598_v7, %v591_v6  ;;  %v606_v11 = vld [vmem:[%s4178_s12 + $0xa0] sm:$0xff]  ;;  %v718_v14 = vpack.c.bf16 %v599_v10, %v592_v9  ;;  %v3344_v16 = vld [vmem:[%s4576_s1 + $0x178] sm:$0xff]   ;;  %v612_v21 = vld [vmem:[%s4178_s12 + $0xd0] sm:$0xff] }
  0xcb   : > { %2955 = vmatpush3.bf16.msra.mxu1 %v3320_v23  ;;  %v725_v15 = vpack.c.bf16 %v613_v12, %v606_v11  ;;  %v3345_v17 = vld [vmem:[%s4576_s1 + $0x138] sm:$0xff]   ;;  %v590_v18 = vld [vmem:[%s4178_s12 + $0x20] sm:$0xff]  ;;  %v604_v24 = vld [vmem:[%s4178_s12 + $0x90] sm:$0xff] }
  0xcc   : > { %2956 = vmatprep.subr.bf16.mxu1 %v3323_v26  ;;  %v597_v19 = vld [vmem:[%s4178_s12 + $0x58] sm:$0xff]  ;;  %v3350_v31 = vld [vmem:[#allocation5 + $0x20] sm:$0xff]   ;;  %v3351_v32 = vld [vmem:[#allocation5 + $0x28] sm:$0xff]  }
  0xcd   : > { %2929 = vmatpush3.bf16.msra.mxu0 %v3322_v25  ;;  %v605_v20 = vld [vmem:[%s4178_s12 + $0x98] sm:$0xff]  ;;  %v716_v22 = vpack.c.bf16 %v597_v19, %v590_v18  ;;  %v611_v25 = vld [vmem:[%s4178_s12 + $0xc8] sm:$0xff]  ;;  %s4534_s12 = scalar_lea.sflag [#allocation4], %s574_s17 }
  0xce   : > { %2930 = vmatprep.subr.bf16.mxu0 %v3325_v28  ;;  %v724_v23 = vpack.c.bf16 %v612_v21, %v605_v20  ;;  %v723_v26 = vpack.c.bf16 %v611_v25, %v604_v24  ;;  %v3347_v28 = vld [vmem:[#allocation5 + $0x8] sm:$0xff]   ;;  %v3352_v33 = vld [vmem:[#allocation5 + $0x30] sm:$0xff]   ;;  %v3354_v35 = vld [vmem:[#allocation7] sm:$0xff]  }
  0xcf   : > { %2957 = vmatpush3.bf16.msra.mxu1 %v3324_v27  ;;  %v3346_v27 = vld [vmem:[#allocation5] sm:$0xff]   ;;  %v3355_v36 = vld [vmem:[#allocation7 + $0x8] sm:$0xff]  }
  0xd0   : > { %2958 = vmatprep.subr.bf16.mxu1 %v3327_v30  ;;  %v3349_v30 = vld [vmem:[#allocation5 + $0x18] sm:$0xff]   ;;  %v3358_v39 = vld [vmem:[#allocation7 + $0x20] sm:$0xff]   ;;  %v3359_v40 = vld [vmem:[#allocation7 + $0x28] sm:$0xff]  }
  0xd1   : > { %2931 = vmatpush3.bf16.msra.mxu0 %v3326_v29  ;;  %v3348_v29 = vld [vmem:[#allocation5 + $0x10] sm:$0xff]  }
  0xd2   : > { %2972 = vmatprep.subr.bf16.mxu0 %v3329_v38  ;;  %v3357_v38 = vld [vmem:[#allocation7 + $0x18] sm:$0xff]  }
  0xd3   : > { %2959 = vmatpush3.bf16.msra.mxu1 %v3328_v34  ;;  %v3353_v34 = vld [vmem:[#allocation5 + $0x38] sm:$0xff]  }
  0xd4   : > { %1067 = vmatmul.mubr.bf16.vlgmr.msra.gmra.mrb[0].mxu0 %v712_v37  ;;  %3063 = vmatprep.subr.bf16.mxu1 %v3343_v3  ;;  %v3356_v37 = vld [vmem:[#allocation7 + $0x10] sm:$0xff]  }
  0xd5   : > { %2973 = vmatpush3.bf16.msra.mxu0 %v3330_v42  ;;  %1074 = vmatprep.mubr.bf16.mxu0 %v720_v55  ;;  %v2758_v42 = vld [vmem:[#allocation2] ss:$0 sm:$0xff] }
  0xd6   : > { %1116 = vmatmul.mubr.bf16.vlgmr.msra.gmra.mrb[0].mxu1 %v714_v45  ;;  %2974 = vmatprep.subr.bf16.mxu0 %v3331_v46 }
  0xd7   : > { %1123 = vmatprep.mubr.bf16.mxu1 %v722_v63  ;;  %3064 = vmatpush3.bf16.msra.mxu1 %v3343_v3 }
  0xd8   : > { %3069 = vmatprep.subr.bf16.mxu1 %v3346_v27 }
  0xd9   : > { %2975 = vmatpush3.bf16.msra.mxu0 %v3332_v47 }
  0xda   : > { %2976 = vmatprep.subr.bf16.mxu0 %v3333_v48 }
  0xdc   : > { %1075 = vmatmul.mubr.bf16.gmra.mrb[4].mxu0 %v719_v59 }
  0xdd   : > { %2977 = vmatpush3.bf16.msra.mxu0 %v3334_v49  ;;  %1164 = vmatprep.mubr.bf16.mxu0 %v717_v8 }
  0xde   : > { %2978 = vmatprep.subr.bf16.mxu0 %v3335_v50  ;;  %1124 = vmatmul.mubr.bf16.gmra.mrb[4].mxu1 %v721_v2 }
  0xdf   : > { %3065 = vmatprep.mubr.msk.bf16.mxu1 %vm1027_vm0, %v718_v14 }
  0xe1   : > { %2979 = vmatpush3.bf16.msra.mxu0 %v3336_v51 }
  0xe2   : > { %2980 = vmatprep.subr.bf16.mxu0 %v3337_v54 }
  0xe5   : > { %2981 = vmatpush3.bf16.msra.mxu0 %v3338_v58 }
  0xe6   : > { %2982 = vmatprep.subr.bf16.mxu0 %v3339_v1  ;;  %3066 = vmatmul.mubr.msk.bf16.vlgmr.msra.gmra.mrb[8].mxu1 %vm1027_vm0, %v725_v15 }
  0xe7   : > { %3070 = vmatpush3.bf16.msra.mxu1 %v3346_v27 }
  0xe8   : > { %3071 = vmatprep.subr.bf16.mxu1 %v3347_v28 }
  0xe9   : > { %2983 = vmatpush3.bf16.msra.mxu0 %v3340_v4 }
  0xea   : > { %2984 = vmatprep.subr.bf16.mxu0 %v3341_v5 }
  0xeb   : > { %3072 = vmatpush3.bf16.msra.mxu1 %v3347_v28 }
  0xec   : > { %3073 = vmatprep.subr.bf16.mxu1 %v3348_v29 }
  0xed   : > { %2985 = vmatpush3.bf16.msra.mxu0 %v3342_v13 }
  0xee   : > { %2986 = vmatprep.subr.bf16.mxu0 %v3344_v16 }
  0xef   : > { %3074 = vmatpush3.bf16.msra.mxu1 %v3348_v29 }
  0xf0   : > { %3075 = vmatprep.subr.bf16.mxu1 %v3349_v30 }
  0xf1   : > { %2987 = vmatpush3.bf16.msra.mxu0 %v3345_v17 }
  0xf2   : > { %3089 = vmatprep.subr.bf16.mxu0 %v3354_v35 }
  0xf3   : > { %3076 = vmatpush3.bf16.msra.mxu1 %v3349_v30 }
  0xf4   : > { %1165 = vmatmul.mubr.bf16.vlgmr.msra.gmra.mrb[8].mxu0 %v716_v22  ;;  %3077 = vmatprep.subr.bf16.mxu1 %v3350_v31 }
  0xf5   : > { %1172 = vmatprep.mubr.bf16.mxu0 %v724_v23  ;;  %3090 = vmatpush3.bf16.msra.mxu0 %v3354_v35 }
  0xf6   : > { %3091 = vmatprep.subr.bf16.mxu0 %v3355_v36 }
  0xf7   : > { %3078 = vmatpush3.bf16.msra.mxu1 %v3350_v31 }
  0xf8   : > { %3079 = vmatprep.subr.bf16.mxu1 %v3351_v32 }
  0xf9   : > { %3092 = vmatpush3.bf16.msra.mxu0 %v3355_v36 }
  0xfa   : > { %3093 = vmatprep.subr.bf16.mxu0 %v3356_v37 }
  0xfb   : > { %3080 = vmatpush3.bf16.msra.mxu1 %v3351_v32 }
  0xfc   : > { %1173 = vmatmul.mubr.bf16.gmra.mrb[12].mxu0 %v723_v26  ;;  %3081 = vmatprep.subr.bf16.mxu1 %v3352_v33 }
  0xfd   : > { %3094 = vmatpush3.bf16.msra.mxu0 %v3356_v37 }
  0xfe   : > { %3095 = vmatprep.subr.bf16.mxu0 %v3357_v38 }
  0xff   : > { %3082 = vmatpush3.bf16.msra.mxu1 %v3352_v33 }
 0x100   : > { %3083 = vmatprep.subr.bf16.mxu1 %v3353_v34 }
 0x101   : > { %3096 = vmatpush3.bf16.msra.mxu0 %v3357_v38 }
 0x102   : > { %3097 = vmatprep.subr.bf16.mxu0 %v3358_v39 }
 0x103   : > { %3084 = vmatpush3.bf16.msra.mxu1 %v3353_v34 }
 0x105   : > { %3098 = vmatpush3.bf16.msra.mxu0 %v3358_v39 }
 0x106   : > { %3099 = vmatprep.subr.bf16.mxu0 %v3359_v40 }
 0x109   : > { %3100 = vmatpush3.bf16.msra.mxu0 %v3359_v40  ;;  %v3360_v40 = vld [vmem:[#allocation7 + $0x30] sm:$0xff]  }
 0x10a   : > { %3101 = vmatprep.subr.bf16.mxu0 %v3360_v40 }
 0x10d   : > { %3102 = vmatpush3.bf16.msra.mxu0 %v3360_v40 }
 0x1a7   : > { %v2932_v41 = vpop.f32.mrb[0].mxu0 }
 0x1a8   : > { %v2933_v43 = vpop.f32.mrb[1].mxu0 }
 0x1a9   : > { %v2934_v44 = vadd.f32 %v2933_v43, %v2932_v41  ;;  %v2935_v45 = vpop.f32.mrb[2].mxu0  ;;  %v2960_v46 = vpop.f32.mrb[0].mxu1  ;;  %v3361_v41 = vld [vmem:[#allocation7 + $0x38] sm:$0xff]   ;;  %v3363_v43 = vld [vmem:[#allocation8 + $0x8] sm:$0xff]  }
 0x1aa   : > { %v2936_v47 = vpop.f32.mrb[3].mxu0  ;;  %v2961_v50 = vpop.f32.mrb[1].mxu1  ;;  %3103 = vmatprep.subr.bf16.mxu0 %v3361_v41 }
 0x1ab   : > { %v1069_v48 = vadd.f32 %v2934_v44, %v2758_v42  ;;  %v2937_v49 = vadd.f32 %v2936_v47, %v2935_v45  ;;  %v2962_v51 = vadd.f32 %v2961_v50, %v2960_v46  ;;  %v2963_v52 = vpop.f32.mrb[2].mxu1  ;;  %3104 = vmatpush3.bf16.msra.mxu0 %v3361_v41  ;;  %v3364_v44 = vld [vmem:[#allocation8 + $0x10] sm:$0xff]   ;;  %v3365_v45 = vld [vmem:[#allocation8 + $0x18] sm:$0xff]   ;;  %v3366_v46 = vld [vmem:[#allocation8 + $0x20] sm:$0xff]  }
 0x1ac   : > { %v2964_v54 = vpop.f32.mrb[3].mxu1  ;;  %v3367_v47 = vld [vmem:[#allocation8 + $0x28] sm:$0xff]  }
 0x1ad   : > { %v1072_v53 = vadd.f32 %v2937_v49, %v2758_v42  ;;  %v1118_v55 = vadd.f32 %v2962_v51, %v1069_v48  ;;  %v2965_v56 = vadd.f32 %v2964_v54, %v2963_v52  ;;  %v2810_v48 = vld [vmem:[%s4579_s4] ss:$0 sm:$0xff] }
 0x1af   : > { %v1121_v57 = vadd.f32 %v2965_v56, %v1072_v53  ;;  %v2938_v58 = vpop.f32.mrb[4].mxu0 }
 0x1b0   : > { %v2939_v59 = vpop.f32.mrb[5].mxu0 }
 0x1b1   : > { %v2940_v60 = vadd.f32 %v2939_v59, %v2938_v58  ;;  %v2941_v61 = vpop.f32.mrb[6].mxu0  ;;  %v2966_v62 = vpop.f32.mrb[4].mxu1 }
 0x1b2   : > { %v2942_v63 = vpop.f32.mrb[7].mxu0  ;;  %v2967_v0 = vpop.f32.mrb[5].mxu1 }
 0x1b3   : > { %v1077_v1 = vadd.f32 %v2940_v60, %v2758_v42  ;;  %v2943_v2 = vadd.f32 %v2942_v63, %v2941_v61  ;;  %v2968_v3 = vadd.f32 %v2967_v0, %v2966_v62  ;;  %v2969_v4 = vpop.f32.mrb[6].mxu1  ;;  %v3368_v63 = vld [vmem:[#allocation8 + $0x30] sm:$0xff]   ;;  %v3369_v0 = vld [vmem:[#allocation8 + $0x38] sm:$0xff]  }
 0x1b4   : > { %v2970_v5 = vpop.f32.mrb[7].mxu1 }
 0x1b5   : > { %v1080_v6 = vadd.f32 %v2943_v2, %v2758_v42  ;;  %v1126_v7 = vadd.f32 %v2968_v3, %v1077_v1  ;;  %v2971_v8 = vadd.f32 %v2970_v5, %v2969_v4  ;;  %v3362_v42 = vld [vmem:[#allocation8] sm:$0xff]   ;;  %v3371_v2 = vld [vmem:[#allocation10 + $0x8] sm:$0xff]   ;;  %v3372_v3 = vld [vmem:[#allocation10 + $0x10] sm:$0xff]  }
 0x1b6   : > { %3109 = vmatprep.subr.bf16.mxu1 %v3362_v42  ;;  %v3370_v1 = vld [vmem:[#allocation10] sm:$0xff]   ;;  %v3373_v4 = vld [vmem:[#allocation10 + $0x18] sm:$0xff]  }
 0x1b7   : > { %v1129_v9 = vadd.f32 %v2971_v8, %v1080_v6  ;;  %3129 = vmatprep.subr.bf16.mxu0 %v3370_v1  ;;  %v3374_v5 = vld [vmem:[#allocation10 + $0x20] sm:$0xff]   ;;  %v3375_v6 = vld [vmem:[#allocation10 + $0x28] sm:$0xff]  }
 0x1b9   : > { %v3067_v10 = vpop.f32.mrb[8].mxu1 }
 0x1ba   : > { %v1215_v11 = vpop.f32.mrb[9].mxu1 }
 0x1bb   : > { %v3068_v12 = vpop.f32.mrb[10].mxu1 }
 0x1bc   : > { %v1218_v13 = vpop.f32.mrb[11].mxu1 }
 0x1c7   : > { %v2988_v14 = vpop.f32.mrb[8].mxu0 }
 0x1c8   : > { %v2989_v15 = vpop.f32.mrb[9].mxu0 }
 0x1c9   : > { %v2990_v16 = vadd.f32 %v2989_v15, %v2988_v14  ;;  %v2991_v17 = vpop.f32.mrb[10].mxu0 }
 0x1ca   : > { %v2992_v18 = vpop.f32.mrb[11].mxu0 }
 0x1cb   : > { %v2993_v19 = vadd.f32 %v2992_v18, %v2991_v17  ;;  %v1167_v20 = vadd.f32 %v2990_v16, %v1118_v55 }
 0x1cd   : > { %v1216_v21 = vadd.f32 %v1215_v11, %v1167_v20  ;;  %v1170_v22 = vadd.f32 %v2993_v19, %v1121_v57 }
 0x1cf   : > { %v1219_v23 = vadd.f32 %v1218_v13, %v1170_v22  ;;  %v2994_v24 = vpop.f32.mrb[12].mxu0  ;;  %v1230_v26 = vmax.f32 %v1216_v21, 0.0  ;;  %v3376_v22 = vld [vmem:[#allocation10 + $0x30] sm:$0xff]  }
 0x1d0   : > { %v2995_v25 = vpop.f32.mrb[13].mxu0 }
 0x1d1   : > { %v1231_v27 = vmax.f32 %v1219_v23, 0.0  ;;  %v2996_v28 = vadd.f32 %v2995_v25, %v2994_v24  ;;  %v2997_v29 = vpop.f32.mrb[14].mxu0  ;;  %v3377_v23 = vld [vmem:[#allocation10 + $0x38] sm:$0xff]   ;;  %v3378_v24 = vld [vmem:[#allocation11] sm:$0xff]   ;;  %v3379_v25 = vld [vmem:[#allocation11 + $0x8] sm:$0xff]  }
 0x1d2   : > { %v2998_v30 = vpop.f32.mrb[15].mxu0 }
 0x1d3   : > { %v1250_v31 = vpack.c.bf16 %v1231_v27, %v1230_v26  ;;  %v1175_v32 = vadd.f32 %v2996_v28, %v1126_v7  ;;  %v2999_v33 = vadd.f32 %v2998_v30, %v2997_v29  ;;  %v2819_v7 = vld [vmem:[%s4581_s6] ss:$0 sm:$0xff]  ;;  %v3380_v26 = vld [vmem:[#allocation11 + $0x10] sm:$0xff]   ;;  %v3382_v28 = vld [vmem:[#allocation11 + $0x20] sm:$0xff]  }
 0x1d4   : > { %v3381_v27 = vld [vmem:[#allocation11 + $0x18] sm:$0xff]   ;;  %v3383_v29 = vld [vmem:[#allocation11 + $0x28] sm:$0xff]  }
 0x1d5   : > { %v1224_v34 = vadd.f32 %v3067_v10, %v1175_v32  ;;  %v1178_v35 = vadd.f32 %v2999_v33, %v1129_v9  ;;  %3085 = vmatprep.mubr.bf16.mxu1 %v1250_v31  ;;  %v2828_v30 = vld [vmem:[%s4583_s8] ss:$0 sm:$0xff] }
 0x1d7   : > { %v1227_v36 = vadd.f32 %v3068_v12, %v1178_v35  ;;  %v1232_v37 = vmax.f32 %v1224_v34, 0.0 }
 0x1d9   : > { %v1233_v38 = vmax.f32 %v1227_v36, 0.0 }
 0x1db   : > { %v1251_v39 = vpack.c.bf16 %v1233_v38, %v1232_v37 }
 0x1dd   : > { %3086 = vmatmul.mubr.bf16.vlgmr.msra.gmra.mrb[12].mxu1 %v1251_v39 }
 0x1de   : > { %3110 = vmatpush3.bf16.msra.mxu1 %v3362_v42 }
 0x1df   : > { %3111 = vmatprep.subr.bf16.mxu1 %v3363_v43 }
 0x1e2   : > { %3112 = vmatpush3.bf16.msra.mxu1 %v3363_v43 }
 0x1e3   : > { %3113 = vmatprep.subr.bf16.mxu1 %v3364_v44 }
 0x1e6   : > { %3114 = vmatpush3.bf16.msra.mxu1 %v3364_v44 }
 0x1e7   : > { %3115 = vmatprep.subr.bf16.mxu1 %v3365_v45 }
 0x1ea   : > { %3116 = vmatpush3.bf16.msra.mxu1 %v3365_v45  ;;  %v3384_v45 = vld [vmem:[#allocation11 + $0x30] sm:$0xff]  }
 0x1eb   : > { %3117 = vmatprep.subr.bf16.mxu1 %v3366_v46 }
 0x1ee   : > { %3118 = vmatpush3.bf16.msra.mxu1 %v3366_v46  ;;  %v3385_v46 = vld [vmem:[#allocation11 + $0x38] sm:$0xff]  }
 0x1ef   : > { %3119 = vmatprep.subr.bf16.mxu1 %v3367_v47 }
 0x1f2   : > { %3120 = vmatpush3.bf16.msra.mxu1 %v3367_v47  ;;  %v3386_v47 = vld [vmem:[%s4588_s13] ss:$28 sps:$4 sm:$0xff]  }
 0x1f3   : > { %3121 = vmatprep.subr.bf16.mxu1 %v3368_v63 }
 0x1f6   : > { %3122 = vmatpush3.bf16.msra.mxu1 %v3368_v63 }
 0x1f7   : > { %3123 = vmatprep.subr.bf16.mxu1 %v3369_v0 }
 0x1fa   : > { %3124 = vmatpush3.bf16.msra.mxu1 %v3369_v0 }
 0x1fb   : > { %3149 = vmatprep.subr.bf16.mxu1 %v3378_v24 }
 0x2b0   : > { %v3087_v49 = vpop.f32.mrb[12].mxu1 }
 0x2b1   : > { %v1350_v50 = vadd.f32 %v3087_v49, %v2810_v48  ;;  %v1341_v51 = vpop.f32.mrb[13].mxu1  ;;  %v3391_v49 = vld [vmem:[%s4588_s13 + $0xc] ss:$28 sps:$4 sm:$0xff]  }
 0x2b2   : > { %v1342_v52 = vadd.f32 %v2810_v48, %v1341_v51  ;;  %v3088_v53 = vpop.f32.mrb[14].mxu1  ;;  %v3392_v51 = vld [vmem:[%s4588_s13 + $0x38] ss:$28 sps:$4 sm:$0xff]  }
 0x2b3   : > { %v1353_v54 = vadd.f32 %v3088_v53, %v2810_v48  ;;  %v1344_v55 = vpop.f32.mrb[15].mxu1  ;;  %v1358_v57 = vmax.f32 %v1350_v50, 0.0  ;;  %v3394_v50 = vld [vmem:[%s4588_s13 + $0x3c] ss:$28 sps:$4 sm:$0xff]   ;;  %v3398_v53 = vld [vmem:[%s4588_s13 + $0x70] ss:$28 sps:$4 sm:$0xff]  }
 0x2b4   : > { %v1345_v56 = vadd.f32 %v2810_v48, %v1344_v55  ;;  %v1356_v59 = vmax.f32 %v1342_v52, 0.0  ;;  %v3388_v48 = vld [vmem:[%s4588_s13 + $0x4] ss:$28 sps:$4 sm:$0xff]   ;;  %v3400_v52 = vld [vmem:[%s4588_s13 + $0x74] ss:$28 sps:$4 sm:$0xff]  }
 0x2b5   : > { %v1359_v58 = vmax.f32 %v1353_v54, 0.0  ;;  %v3406_v54 = vld [vmem:[%s4588_s13 + $0xac] ss:$28 sps:$4 sm:$0xff]  }
 0x2b6   : > { %v1357_v60 = vmax.f32 %v1345_v56, 0.0  ;;  %v3404_v55 = vld [vmem:[%s4588_s13 + $0xa8] ss:$28 sps:$4 sm:$0xff]  }
 0x2b7   : > { %v1377_v61 = vpack.c.bf16 %v1359_v58, %v1358_v57  ;;  %v3412_v56 = vld [vmem:[%s4588_s13 + $0xe4] ss:$28 sps:$4 sm:$0xff]   ;;  %v3418_v58 = vld [vmem:[%s4588_s13 + $0x11c] ss:$28 sps:$4 sm:$0xff]  }
 0x2b8   : > { %v1376_v62 = vpack.c.bf16 %v1357_v60, %v1356_v59  ;;  %v3410_v57 = vld [vmem:[%s4588_s13 + $0xe0] ss:$28 sps:$4 sm:$0xff]   ;;  %v3416_v59 = vld [vmem:[%s4588_s13 + $0x118] ss:$28 sps:$4 sm:$0xff]  }
 0x2b9   : > { %v2837_v60 = vld [vmem:[%s4585_s10] ss:$0 sm:$0xff] }
 0x2ba   : > { %3105 = vmatprep.mubr.bf16.mxu0 %v1376_v62 }
 0x2bb   : > { %3106 = vmatmul.mubr.bf16.vlgmr.msra.gmra.mrb[16].mxu0 %v1377_v61 }
 0x2bc   : > { %3130 = vmatpush3.bf16.msra.mxu0 %v3370_v1 }
 0x2bd   : > { %3131 = vmatprep.subr.bf16.mxu0 %v3371_v2 }
 0x2c0   : > { %3132 = vmatpush3.bf16.msra.mxu0 %v3371_v2 }
 0x2c1   : > { %3133 = vmatprep.subr.bf16.mxu0 %v3372_v3 }
 0x2c4   : > { %3134 = vmatpush3.bf16.msra.mxu0 %v3372_v3 }
 0x2c5   : > { %3135 = vmatprep.subr.bf16.mxu0 %v3373_v4 }
 0x2c8   : > { %3136 = vmatpush3.bf16.msra.mxu0 %v3373_v4 }
 0x2c9   : > { %3137 = vmatprep.subr.bf16.mxu0 %v3374_v5 }
 0x2cc   : > { %3138 = vmatpush3.bf16.msra.mxu0 %v3374_v5 }
 0x2cd   : > { %3139 = vmatprep.subr.bf16.mxu0 %v3375_v6 }
 0x2d0   : > { %3140 = vmatpush3.bf16.msra.mxu0 %v3375_v6 }
 0x2d1   : > { %3141 = vmatprep.subr.bf16.mxu0 %v3376_v22 }
 0x2d4   : > { %3142 = vmatpush3.bf16.msra.mxu0 %v3376_v22  ;;  %v3424_v22 = vld [vmem:[%s4588_s13 + $0x154] ss:$28 sps:$4 sm:$0xff]  }
 0x2d5   : > { %3143 = vmatprep.subr.bf16.mxu0 %v3377_v23 }
 0x2d8   : > { %3144 = vmatpush3.bf16.msra.mxu0 %v3377_v23  ;;  %v3427_v23 = vld [vmem:[%s4588_s13 + $0x15c] ss:$28 sps:$4 sm:$0xff]  }
 0x2d9   : > { %2255 = vmatprep.subr.bf16.mxu0 %v3388_v48 }
 0x38e   : > { %v3107_v8 = vpop.f32.mrb[16].mxu0 }
 0x38f   : > { %v1476_v9 = vadd.f32 %v3107_v8, %v2819_v7  ;;  %v1467_v10 = vpop.f32.mrb[17].mxu0 }
 0x390   : > { %v1468_v11 = vadd.f32 %v2819_v7, %v1467_v10  ;;  %v3108_v12 = vpop.f32.mrb[18].mxu0 }
 0x391   : > { %v1479_v13 = vadd.f32 %v3108_v12, %v2819_v7  ;;  %v1470_v14 = vpop.f32.mrb[19].mxu0  ;;  %v1484_v16 = vmax.f32 %v1476_v9, 0.0  ;;  %v3397_v12 = vld [vmem:[%s4588_s13 + $0x44] ss:$28 sps:$4 sm:$0xff]  }
 0x392   : > { %v1471_v15 = vadd.f32 %v2819_v7, %v1470_v14  ;;  %v1482_v18 = vmax.f32 %v1468_v11, 0.0  ;;  %v3389_v11 = vld [vmem:[%s4588_s13 + $0x8] ss:$28 sps:$4 sm:$0xff]   ;;  %v3403_v14 = vld [vmem:[%s4588_s13 + $0x7c] ss:$28 sps:$4 sm:$0xff]  }
 0x393   : > { %v1485_v17 = vmax.f32 %v1479_v13, 0.0  ;;  %v3395_v13 = vld [vmem:[%s4588_s13 + $0x40] ss:$28 sps:$4 sm:$0xff]  }
 0x394   : > { %v1483_v19 = vmax.f32 %v1471_v15, 0.0  ;;  %v3401_v15 = vld [vmem:[%s4588_s13 + $0x78] ss:$28 sps:$4 sm:$0xff]  }
 0x395   : > { %v1503_v20 = vpack.c.bf16 %v1485_v17, %v1484_v16  ;;  %v3409_v16 = vld [vmem:[%s4588_s13 + $0xb4] ss:$28 sps:$4 sm:$0xff]  }
 0x396   : > { %v1502_v21 = vpack.c.bf16 %v1483_v19, %v1482_v18  ;;  %v3407_v17 = vld [vmem:[%s4588_s13 + $0xb0] ss:$28 sps:$4 sm:$0xff]   ;;  %v3413_v19 = vld [vmem:[%s4588_s13 + $0xe8] ss:$28 sps:$4 sm:$0xff]  }
 0x397   : > { %v3415_v18 = vld [vmem:[%s4588_s13 + $0xec] ss:$28 sps:$4 sm:$0xff]  }
 0x398   : > { %3125 = vmatprep.mubr.bf16.mxu1 %v1502_v21  ;;  %v3419_v21 = vld [vmem:[%s4588_s13 + $0x120] ss:$28 sps:$4 sm:$0xff]  }
 0x399   : > { %3126 = vmatmul.mubr.bf16.vlgmr.msra.gmra.mrb[16].mxu1 %v1503_v20  ;;  %v3421_v20 = vld [vmem:[%s4588_s13 + $0x124] ss:$28 sps:$4 sm:$0xff]  }
 0x39a   : > { %3150 = vmatpush3.bf16.msra.mxu1 %v3378_v24  ;;  %v3422_v24 = vld [vmem:[%s4588_s13 + $0x150] ss:$28 sps:$4 sm:$0xff]  }
 0x39b   : > { %3151 = vmatprep.subr.bf16.mxu1 %v3379_v25 }
 0x39e   : > { %3152 = vmatpush3.bf16.msra.mxu1 %v3379_v25  ;;  %v3425_v25 = vld [vmem:[%s4588_s13 + $0x158] ss:$28 sps:$4 sm:$0xff]  }
 0x39f   : > { %3153 = vmatprep.subr.bf16.mxu1 %v3380_v26 }
 0x3a2   : > { %3154 = vmatpush3.bf16.msra.mxu1 %v3380_v26  ;;  %v3430_v26 = vld [vmem:[%s4588_s13 + $0x18c] ss:$28 sps:$4 sm:$0xff]  }
 0x3a3   : > { %3155 = vmatprep.subr.bf16.mxu1 %v3381_v27 }
 0x3a6   : > { %3156 = vmatpush3.bf16.msra.mxu1 %v3381_v27  ;;  %v3433_v27 = vld [vmem:[%s4588_s13 + $0x194] ss:$28 sps:$4 sm:$0xff]  }
 0x3a7   : > { %3157 = vmatprep.subr.bf16.mxu1 %v3382_v28 }
 0x3aa   : > { %3158 = vmatpush3.bf16.msra.mxu1 %v3382_v28  ;;  %v3428_v28 = vld [vmem:[%s4588_s13 + $0x188] ss:$28 sps:$4 sm:$0xff]  }
 0x3ab   : > { %3159 = vmatprep.subr.bf16.mxu1 %v3383_v29 }
 0x3ae   : > { %3160 = vmatpush3.bf16.msra.mxu1 %v3383_v29  ;;  %v3431_v29 = vld [vmem:[%s4588_s13 + $0x190] ss:$28 sps:$4 sm:$0xff]  }
 0x3af   : > { %3161 = vmatprep.subr.bf16.mxu1 %v3384_v45 }
 0x3b2   : > { %3162 = vmatpush3.bf16.msra.mxu1 %v3384_v45 }
 0x3b3   : > { %3163 = vmatprep.subr.bf16.mxu1 %v3385_v46 }
 0x3b6   : > { %3164 = vmatpush3.bf16.msra.mxu1 %v3385_v46 }
 0x3b7   : > { %2308 = vmatprep.subr.bf16.mxu1 %v3391_v49  ;;  %v3440_v49 = vld [vmem:[%s4588_s13 + $0x4c] ss:$28 sps:$4 sm:$0xff]  }
 0x46c   : > { %v3127_v31 = vpop.f32.mrb[16].mxu1 }
 0x46d   : > { %v1602_v32 = vadd.f32 %v3127_v31, %v2828_v30  ;;  %v1593_v33 = vpop.f32.mrb[17].mxu1  ;;  %v3778_v31 = vmov 0  }
 0x46e   : > { %v1594_v34 = vadd.f32 %v2828_v30, %v1593_v33  ;;  %v3128_v35 = vpop.f32.mrb[18].mxu1  ;;  %v2846_v33 = vld [vmem:[%s4633_s16] ss:$0 sm:$0xff]  ;;  %s4483_s16 = scalar_lea.vmem [#allocation13], %s3189_s20 }
 0x46f   : > { %v1605_v36 = vadd.f32 %v3128_v35, %v2828_v30  ;;  %v1596_v37 = vpop.f32.mrb[19].mxu1  ;;  %v1610_v39 = vmax.f32 %v1602_v32, 0.0  ;;  %v3437_v32 = vld [vmem:[%s4588_s13 + $0x18] ss:$28 sps:$4 sm:$0xff]   ;;  %s2618_s21 = sshll.u32 %s4483_s16, 4  ;;  %s4522_s21 = int_to_ptr.vmem [resolvable:$true] %s2618_s21 }
 0x470   : > { %v1597_v38 = vadd.f32 %v2828_v30, %v1596_v37  ;;  %v1608_v41 = vmax.f32 %v1594_v34, 0.0  ;;  %v3436_v30 = vld [vmem:[%s4588_s13 + $0x14] ss:$28 sps:$4 sm:$0xff]   ;;  %s3690_s14 = scalar_lea.vmem %s4522_s21, 3584  ;;  %p3697_p5 = scmp.lt.s32.totalorder %s4522_s21, %s3695_s29 }
 0x471   : > { %v1611_v40 = vmax.f32 %v1605_v36, 0.0  ;;  %p3691_p13 = scmp.ne.s32.totalorder %s4522_s21, %s3690_s14  ;;  %p3698_p0 = scmp.lt.s32.totalorder %s3696_s25, %s3690_s14 }
 0x472   : > { %v1609_v42 = vmax.f32 %v1597_v38, 0.0 }
 0x473   : > { %v1629_v43 = vpack.c.bf16 %v1611_v40, %v1610_v39  ;;  %p3692_p6 = pnand %p3691_p13, %p4638_p1  ;;  %p3699_p10 = por %p3698_p0, %p3697_p5 }
 0x474   : > { %v1628_v44 = vpack.c.bf16 %v1609_v42, %v1608_v41 }
 0x475   : > { %p3693_p9 = pneg %p3692_p6 }
 0x476   : > { %3145 = vmatprep.mubr.bf16.mxu0 %v1628_v44 }
 0x477   : > { %3146 = vmatmul.mubr.bf16.vlgmr.msra.gmra.mrb[20].mxu0 %v1629_v43  ;;  %p3700_p2 = pnand %p3699_p10, %p3693_p9 }
 0x478   : > { %2256 = vmatpush1.bf16.msra.mxu0 %v3386_v47  ;;  %2287 = vmatprep.mubr.bf16.mxu0 %v3778_v31  ;;  %v3434_v47 = vld [vmem:[%s4588_s13 + $0x10] ss:$28 sps:$4 sm:$0xff]  }
 0x479   : > { %2257 = vmatprep.subr.bf16.mxu0 %v3394_v50  ;;  %v3441_v50 = vld [vmem:[%s4588_s13 + $0x50] ss:$28 sps:$4 sm:$0xff]  }
 0x47c   : > { %2258 = vmatpush1.bf16.msra.mxu0 %v3392_v51  ;;  %v3438_v51 = vld [vmem:[%s4588_s13 + $0x48] ss:$28 sps:$4 sm:$0xff]  }
 0x47d   : > { %2259 = vmatprep.subr.bf16.mxu0 %v3400_v52  ;;  %v3444_v52 = vld [vmem:[%s4588_s13 + $0x84] ss:$28 sps:$4 sm:$0xff]  }
 0x480   : > { %2260 = vmatpush1.bf16.msra.mxu0 %v3398_v53  ;;  %v3445_v53 = vld [vmem:[%s4588_s13 + $0x88] ss:$28 sps:$4 sm:$0xff]  }
 0x481   : > { %2261 = vmatprep.subr.bf16.mxu0 %v3406_v54  ;;  %v3442_v54 = vld [vmem:[%s4588_s13 + $0x80] ss:$28 sps:$4 sm:$0xff]  }
 0x484   : > { %2262 = vmatpush1.bf16.msra.mxu0 %v3404_v55  ;;  %v3448_v55 = vld [vmem:[%s4588_s13 + $0xbc] ss:$28 sps:$4 sm:$0xff]  }
 0x485   : > { %2263 = vmatprep.subr.bf16.mxu0 %v3412_v56  ;;  %v3449_v56 = vld [vmem:[%s4588_s13 + $0xc0] ss:$28 sps:$4 sm:$0xff]  }
 0x488   : > { %2264 = vmatpush1.bf16.msra.mxu0 %v3410_v57  ;;  %v3446_v57 = vld [vmem:[%s4588_s13 + $0xb8] ss:$28 sps:$4 sm:$0xff]  }
 0x489   : > { %2265 = vmatprep.subr.bf16.mxu0 %v3418_v58  ;;  %v3452_v58 = vld [vmem:[%s4588_s13 + $0xf4] ss:$28 sps:$4 sm:$0xff]  }
 0x48c   : > { %2266 = vmatpush1.bf16.msra.mxu0 %v3416_v59  ;;  %v3453_v59 = vld [vmem:[%s4588_s13 + $0xf8] ss:$28 sps:$4 sm:$0xff]  }
 0x48d   : > { %2267 = vmatprep.subr.bf16.mxu0 %v3424_v22 }
 0x490   : > { %2268 = vmatpush1.bf16.msra.mxu0 %v3422_v24 }
 0x491   : > { %2269 = vmatprep.subr.bf16.mxu0 %v3430_v26 }
 0x494   : > { %2270 = vmatpush1.bf16.msra.mxu0 %v3428_v28 }
 0x495   : > { %2361 = vmatprep.subr.bf16.mxu0 %v3436_v30 }
 0x54a   : > { %v3147_v61 = vpop.f32.mrb[20].mxu0 }
 0x54b   : > { %v1728_v62 = vadd.f32 %v3147_v61, %v2837_v60  ;;  %v1719_v63 = vpop.f32.mrb[21].mxu0  ;;  %v3456_v61 = vld [vmem:[%s4588_s13 + $0x12c] ss:$28 sps:$4 sm:$0xff]  }
 0x54c   : > { %v1720_v0 = vadd.f32 %v2837_v60, %v1719_v63  ;;  %v3148_v1 = vpop.f32.mrb[22].mxu0  ;;  %v3454_v63 = vld [vmem:[%s4588_s13 + $0x128] ss:$28 sps:$4 sm:$0xff]  }
 0x54d   : > { %v1731_v2 = vadd.f32 %v3148_v1, %v2837_v60  ;;  %v1722_v3 = vpop.f32.mrb[23].mxu0  ;;  %v1736_v5 = vmax.f32 %v1728_v62, 0.0  ;;  %v3457_v62 = vld [vmem:[%s4588_s13 + $0x130] ss:$28 sps:$4 sm:$0xff]   ;;  %v3461_v1 = vld [vmem:[%s4588_s13 + $0x168] ss:$28 sps:$4 sm:$0xff]  }
 0x54e   : > { %v1723_v4 = vadd.f32 %v2837_v60, %v1722_v3  ;;  %v1734_v7 = vmax.f32 %v1720_v0, 0.0  ;;  %v3450_v60 = vld [vmem:[%s4588_s13 + $0xf0] ss:$28 sps:$4 sm:$0xff]   ;;  %v3460_v0 = vld [vmem:[%s4588_s13 + $0x164] ss:$28 sps:$4 sm:$0xff]  }
 0x54f   : > { %v1737_v6 = vmax.f32 %v1731_v2, 0.0  ;;  %v3458_v2 = vld [vmem:[%s4588_s13 + $0x160] ss:$28 sps:$4 sm:$0xff]  }
 0x550   : > { %v1735_v8 = vmax.f32 %v1723_v4, 0.0  ;;  %v3464_v3 = vld [vmem:[%s4588_s13 + $0x19c] ss:$28 sps:$4 sm:$0xff]  }
 0x551   : > { %v1755_v9 = vpack.c.bf16 %v1737_v6, %v1736_v5  ;;  %v3465_v4 = vld [vmem:[%s4588_s13 + $0x1a0] ss:$28 sps:$4 sm:$0xff]   ;;  %v3462_v5 = vld [vmem:[%s4588_s13 + $0x198] ss:$28 sps:$4 sm:$0xff]   ;;  %v1932_v6 = vlaneseq }
 0x552   : > { %v1754_v10 = vpack.c.bf16 %v1735_v8, %v1734_v7 }
 0x553   : > { %v4465_v7 = vshrl.u32 %v1932_v6, 7 }
 0x554   : > { %3165 = vmatprep.mubr.bf16.mxu1 %v1754_v10  ;;  %v4472_v10 = vld [vmem:[%s4634_s18] sm:$0x7f] }
 0x555   : > { %3166 = vmatmul.mubr.bf16.vlgmr.msra.gmra.mrb[20].mxu1 %v1755_v9  ;;  %v1934_v8 = vsub.s32 0, %v4465_v7  ;;  %v1942_v9 = vsub.s32 2, %v4465_v7 }
 0x556   : > { %2309 = vmatpush1.bf16.msra.mxu1 %v3389_v11  ;;  %2340 = vmatprep.mubr.bf16.mxu1 %v3778_v31  ;;  %v1938_v11 = vsub.s32 1, %v4465_v7 }
 0x557   : > { %2310 = vmatprep.subr.bf16.mxu1 %v3397_v12  ;;  %v1946_v12 = vsub.s32 3, %v4465_v7 }
 0x55a   : > { %2311 = vmatpush1.bf16.msra.mxu1 %v3395_v13  ;;  %v1935_v13 = vrot.slane %v4472_v10, %v1934_v8 }
 0x55b   : > { %2312 = vmatprep.subr.bf16.mxu1 %v3403_v14  ;;  %v1943_v14 = vrot.slane %v4472_v10, %v1942_v9 }
 0x55e   : > { %2313 = vmatpush1.bf16.msra.mxu1 %v3401_v15  ;;  %v1939_v15 = vrot.slane %v4472_v10, %v1938_v11 }
 0x55f   : > { %2314 = vmatprep.subr.bf16.mxu1 %v3409_v16  ;;  %v1947_v16 = vrot.slane %v4472_v10, %v1946_v12 }
 0x562   : > { %2315 = vmatpush1.bf16.msra.mxu1 %v3407_v17 }
 0x563   : > { %2316 = vmatprep.subr.bf16.mxu1 %v3415_v18 }
 0x566   : > { %2317 = vmatpush1.bf16.msra.mxu1 %v3413_v19 }
 0x567   : > { %2318 = vmatprep.subr.bf16.mxu1 %v3421_v20 }
 0x56a   : > { %2319 = vmatpush1.bf16.msra.mxu1 %v3419_v21 }
 0x56b   : > { %2320 = vmatprep.subr.bf16.mxu1 %v3427_v23 }
 0x56e   : > { %2321 = vmatpush1.bf16.msra.mxu1 %v3425_v25 }
 0x56f   : > { %2322 = vmatprep.subr.bf16.mxu1 %v3433_v27 }
 0x572   : > { %2323 = vmatpush1.bf16.msra.mxu1 %v3431_v29 }
 0x573   : > { %3169 = vmatprep.subr.bf16.mxu1 %v3437_v32 }
 0x628   : > { %v3167_v34 = vpop.f32.mrb[20].mxu1 }
 0x629   : > { %v1854_v35 = vadd.f32 %v3167_v34, %v2846_v33  ;;  %v1845_v36 = vpop.f32.mrb[21].mxu1 }
 0x62a   : > { %v1846_v37 = vadd.f32 %v2846_v33, %v1845_v36  ;;  %v3168_v38 = vpop.f32.mrb[22].mxu1 }
 0x62b   : > { %v1857_v39 = vadd.f32 %v3168_v38, %v2846_v33  ;;  %v1848_v40 = vpop.f32.mrb[23].mxu1  ;;  %v1862_v42 = vmax.f32 %v1854_v35, 0.0 }
 0x62c   : > { %v1849_v41 = vadd.f32 %v2846_v33, %v1848_v40  ;;  %v1860_v44 = vmax.f32 %v1846_v37, 0.0 }
 0x62d   : > { %v1863_v43 = vmax.f32 %v1857_v39, 0.0 }
 0x62e   : > { %v1861_v45 = vmax.f32 %v1849_v41, 0.0 }
 0x62f   : > { %v4389_v46 = vpack.c.bf16 %v1863_v43, %v1862_v42 }
 0x630   : > { %v1928_v48 = vpack.c.bf16 %v1861_v45, %v1860_v44 }
 0x632   : > { %2288 = vmatmul.mubr.bf16.vlgmr.msra.gmra.mrb[24].mxu0 %v1928_v48  ;;  %2341 = vmatmul.mubr.bf16.vlgmr.msra.gmra.mrb[24].mxu1 %v1928_v48 }
 0x633   : > { %2362 = vmatpush1.bf16.msra.mxu0 %v3434_v47  ;;  %3170 = vmatpush3.bf16.msra.mxu1 %v3437_v32 }
 0x634   : > { %2363 = vmatprep.subr.bf16.mxu0 %v3440_v49  ;;  %3171 = vmatprep.subr.bf16.mxu1 %v3441_v50 }
 0x635   : > { %2297 = vmatprep.mubr.bf16.mxu0 %v3778_v31  ;;  %2350 = vmatprep.mubr.bf16.mxu1 %v3778_v31 }
 0x637   : > { %2364 = vmatpush1.bf16.msra.mxu0 %v3438_v51  ;;  %3172 = vmatpush3.bf16.msra.mxu1 %v3441_v50 }
 0x638   : > { %2365 = vmatprep.subr.bf16.mxu0 %v3444_v52  ;;  %3173 = vmatprep.subr.bf16.mxu1 %v3445_v53 }
 0x63a   : > { %2298 = vmatmul.mubr.bf16.gmra.mrb[28].mxu0 %v4389_v46  ;;  %2351 = vmatmul.mubr.bf16.gmra.mrb[28].mxu1 %v4389_v46 }
 0x63b   : > { %2366 = vmatpush1.bf16.msra.mxu0 %v3442_v54  ;;  %3174 = vmatpush3.bf16.msra.mxu1 %v3445_v53 }
 0x63c   : > { %3185 = vmatprep.mubr.bf16.mxu1 %v1928_v48  ;;  %2367 = vmatprep.subr.bf16.mxu0 %v3448_v55 }
 0x63d   : > { %3175 = vmatprep.subr.bf16.mxu1 %v3449_v56  ;;  %2393 = vmatprep.mubr.bf16.mxu0 %v3778_v31 }
 0x63f   : > { %2368 = vmatpush1.bf16.msra.mxu0 %v3446_v57  ;;  %3176 = vmatpush3.bf16.msra.mxu1 %v3449_v56 }
 0x640   : > { %2369 = vmatprep.subr.bf16.mxu0 %v3452_v58  ;;  %3177 = vmatprep.subr.bf16.mxu1 %v3453_v59 }
 0x643   : > { %2370 = vmatpush1.bf16.msra.mxu0 %v3450_v60  ;;  %3178 = vmatpush3.bf16.msra.mxu1 %v3453_v59 }
 0x644   : > { %2371 = vmatprep.subr.bf16.mxu0 %v3456_v61  ;;  %3179 = vmatprep.subr.bf16.mxu1 %v3457_v62 }
 0x647   : > { %2372 = vmatpush1.bf16.msra.mxu0 %v3454_v63  ;;  %3180 = vmatpush3.bf16.msra.mxu1 %v3457_v62 }
 0x648   : > { %2373 = vmatprep.subr.bf16.mxu0 %v3460_v0  ;;  %3181 = vmatprep.subr.bf16.mxu1 %v3461_v1 }
 0x64b   : > { %2374 = vmatpush1.bf16.msra.mxu0 %v3458_v2  ;;  %3182 = vmatpush3.bf16.msra.mxu1 %v3461_v1 }
 0x64c   : > { %2375 = vmatprep.subr.bf16.mxu0 %v3464_v3  ;;  %3183 = vmatprep.subr.bf16.mxu1 %v3465_v4 }
 0x64f   : > { %2376 = vmatpush1.bf16.msra.mxu0 %v3462_v5  ;;  %3184 = vmatpush3.bf16.msra.mxu1 %v3465_v4 }
 0x652   : > { %2394 = vmatmul.mubr.bf16.vlgmr.msra.gmra.mrb[32].mxu0 %v1928_v48  ;;  %3186 = vmatmul.mubr.bf16.vlgmr.msra.gmra.mrb[32].mxu1 %v4389_v46 }
 0x653   : > { %2403 = vmatprep.mubr.bf16.mxu0 %v3778_v31 }
 0x65a   : > { %2404 = vmatmul.mubr.bf16.gmra.mrb[36].mxu0 %v4389_v46 }
 0x705   : > { %v2289_v17 = vpop.f32.mrb[24].mxu0  ;;  %v2342_v18 = vpop.f32.mrb[24].mxu1 }
 0x706   : > { %v2290_v19 = vadd.f32 %v2289_v17, %v1935_v13  ;;  %v2343_v20 = vadd.f32 %v2342_v18, %v1943_v14  ;;  %v2291_v21 = vpop.f32.mrb[25].mxu0  ;;  %v2344_v22 = vpop.f32.mrb[25].mxu1 }
 0x707   : > { %v2292_v23 = vadd.f32 %v2291_v21, %v1939_v15  ;;  %v2345_v24 = vadd.f32 %v2344_v22, %v1947_v16  ;;  %v2293_v25 = vpop.f32.mrb[26].mxu0  ;;  %v2346_v26 = vpop.f32.mrb[26].mxu1 }
 0x708   : > { %v2463_v27 = vmul.f32 0.5, %v2290_v19  ;;  %v2465_v28 = vmul.f32 0.5, %v2343_v20  ;;  %v2294_v29 = vadd.f32 %v2293_v25, %v1935_v13  ;;  %v2347_v30 = vadd.f32 %v2346_v26, %v1943_v14  ;;  %v2295_v31 = vpop.f32.mrb[27].mxu0  ;;  %v2348_v32 = vpop.f32.mrb[27].mxu1 }
 0x709   : > { %v2464_v33 = vmul.f32 0.5, %v2292_v23  ;;  %v2466_v34 = vmul.f32 0.5, %v2345_v24  ;;  %v2296_v35 = vadd.f32 %v2295_v31, %v1939_v15  ;;  %v2349_v36 = vadd.f32 %v2348_v32, %v1947_v16 }
 0x70a   : > { %3466 = vtanh.f32 %v2463_v27  ;;  %v2470_v37 = vmul.f32 0.5, %v2294_v29  ;;  %v2472_v38 = vmul.f32 0.5, %v2347_v30  ;;  %v1950_v32 = vsub.s32 4, %v4465_v7 }
 0x70b   : > { %3468 = vtanh.f32 %v2465_v28  ;;  %v2471_v39 = vmul.f32 0.5, %v2296_v35  ;;  %v2473_v40 = vmul.f32 0.5, %v2349_v36 }
 0x70c   : > { %3470 = vtanh.f32 %v2464_v33  ;;  %v1958_v33 = vsub.s32 6, %v4465_v7 }
 0x70d   : > { %3472 = vtanh.f32 %v2466_v34  ;;  %v2299_v41 = vpop.f32.mrb[28].mxu0  ;;  %v2352_v42 = vpop.f32.mrb[28].mxu1 }
 0x70e   : > { %3474 = vtanh.f32 %v2470_v37  ;;  %v2300_v43 = vadd.f32 %v2299_v41, %v1935_v13  ;;  %v2353_v44 = vadd.f32 %v2352_v42, %v1943_v14  ;;  %v2301_v45 = vpop.f32.mrb[29].mxu0  ;;  %v2354_v46 = vpop.f32.mrb[29].mxu1  ;;  %v1954_v37 = vsub.s32 5, %v4465_v7 }
 0x70f   : > { %3476 = vtanh.f32 %v2472_v38  ;;  %v2302_v47 = vadd.f32 %v2301_v45, %v1939_v15  ;;  %v2355_v48 = vadd.f32 %v2354_v46, %v1947_v16  ;;  %v2303_v49 = vpop.f32.mrb[30].mxu0  ;;  %v2356_v50 = vpop.f32.mrb[30].mxu1  ;;  %v1959_v7 = vrot.slane %v4472_v10, %v1958_v33 }
 0x710   : > { %3478 = vtanh.f32 %v2471_v39  ;;  %v2477_v51 = vmul.f32 0.5, %v2300_v43  ;;  %v2479_v52 = vmul.f32 0.5, %v2353_v44  ;;  %v2304_v53 = vadd.f32 %v2303_v49, %v1935_v13  ;;  %v2305_v54 = vpop.f32.mrb[31].mxu0  ;;  %v2358_v55 = vpop.f32.mrb[31].mxu1 }
 0x711   : > { %3480 = vtanh.f32 %v2473_v40  ;;  %v2478_v56 = vmul.f32 0.5, %v2302_v47  ;;  %v2480_v57 = vmul.f32 0.5, %v2355_v48  ;;  %v2357_v58 = vadd.f32 %v2356_v50, %v1943_v14 }
 0x712   : > { %3482 = vtanh.f32 %v2477_v51  ;;  %v2484_v59 = vmul.f32 0.5, %v2304_v53  ;;  %v2306_v60 = vadd.f32 %v2305_v54, %v1939_v15  ;;  %v2359_v61 = vadd.f32 %v2358_v55, %v1947_v16 }
 0x713   : > { %3484 = vtanh.f32 %v2479_v52  ;;  %v2486_v62 = vmul.f32 0.5, %v2357_v58  ;;  %v1951_v47 = vrot.slane %v4472_v10, %v1950_v32  ;;  %v1955_v51 = vrot.slane %v4472_v10, %v1954_v37 }
 0x714   : > { %v3467_v63 = vpop.eup %3466  ;;  %3486 = vtanh.f32 %v2478_v56  ;;  %v2485_v0 = vmul.f32 0.5, %v2306_v60  ;;  %v2487_v3 = vmul.f32 0.5, %v2359_v61 }
 0x715   : > { %v3469_v1 = vpop.eup %3468  ;;  %v2519_v2 = vmul.f32 0.5, %v3467_v63  ;;  %3488 = vtanh.f32 %v2480_v57 }
 0x716   : > { %v3471_v4 = vpop.eup %3470  ;;  %v2521_v5 = vmul.f32 0.5, %v3469_v1  ;;  %3490 = vtanh.f32 %v2484_v59 }
 0x717   : > { %v3473_v6 = vpop.eup %3472  ;;  %v2547_v8 = vadd.f32 0.5, %v2519_v2  ;;  %v2520_v9 = vmul.f32 0.5, %v3471_v4  ;;  %3492 = vtanh.f32 %v2486_v62 }
 0x718   : > { %v3475_v11 = vpop.eup %3474  ;;  %v2549_v12 = vadd.f32 0.5, %v2521_v5  ;;  %v2522_v13 = vmul.f32 0.5, %v3473_v6  ;;  %3494 = vtanh.f32 %v2485_v0 }
 0x719   : > { %v3477_v14 = vpop.eup %3476  ;;  %2575 = vst [vmem:[%s4483_s16] sm:$0xff] %v2547_v8  ;;  %v2548_v15 = vadd.f32 0.5, %v2520_v9  ;;  %v2526_v16 = vmul.f32 0.5, %v3475_v11  ;;  %3496 = vtanh.f32 %v2487_v3 }
 0x71a   : > { %v3479_v17 = vpop.eup %3478  ;;  %2577 = vst [vmem:[%s4483_s16 + $0x10] sm:$0xff] %v2549_v12  ;;  %v2550_v18 = vadd.f32 0.5, %v2522_v13  ;;  %v2528_v19 = vmul.f32 0.5, %v3477_v14 }
 0x71b   : > { %v3481_v20 = vpop.eup %3480  ;;  %2576 = vst [vmem:[%s4483_s16 + $0x8] sm:$0xff] %v2548_v15  ;;  %v2554_v21 = vadd.f32 0.5, %v2526_v16  ;;  %v2527_v22 = vmul.f32 0.5, %v3479_v17 }
 0x71c   : > { %v3483_v23 = vpop.eup %3482  ;;  %2578 = vst [vmem:[%s4483_s16 + $0x18] sm:$0xff] %v2550_v18  ;;  %v2556_v24 = vadd.f32 0.5, %v2528_v19  ;;  %v2529_v25 = vmul.f32 0.5, %v3481_v20 }
 0x71d   : > { %v3485_v26 = vpop.eup %3484  ;;  %2582 = vst [vmem:[%s4483_s16 + $0x38] sm:$0xff] %v2554_v21  ;;  %v2555_v27 = vadd.f32 0.5, %v2527_v22  ;;  %v2533_v28 = vmul.f32 0.5, %v3483_v23 }
 0x71e   : > { %v3487_v29 = vpop.eup %3486  ;;  %2584 = vst [vmem:[%s4483_s16 + $0x48] sm:$0xff] %v2556_v24  ;;  %v2557_v30 = vadd.f32 0.5, %v2529_v25  ;;  %v2535_v31 = vmul.f32 0.5, %v3485_v26 }
 0x71f   : > { %v3489_v34 = vpop.eup %3488  ;;  %2583 = vst [vmem:[%s4483_s16 + $0x40] sm:$0xff] %v2555_v27  ;;  %v2561_v35 = vadd.f32 0.5, %v2533_v28  ;;  %v2534_v36 = vmul.f32 0.5, %v3487_v29 }
 0x720   : > { %v3491_v38 = vpop.eup %3490  ;;  %2585 = vst [vmem:[%s4483_s16 + $0x50] sm:$0xff] %v2557_v30  ;;  %v2563_v39 = vadd.f32 0.5, %v2535_v31  ;;  %v2536_v40 = vmul.f32 0.5, %v3489_v34 }
 0x721   : > { %v3493_v41 = vpop.eup %3492  ;;  %2589 = vst [vmem:[%s4483_s16 + $0x70] sm:$0xff] %v2561_v35  ;;  %v2562_v42 = vadd.f32 0.5, %v2534_v36  ;;  %v2540_v43 = vmul.f32 0.5, %v3491_v38 }
 0x722   : > { %v3495_v44 = vpop.eup %3494  ;;  %2591 = vst [vmem:[%s4483_s16 + $0x80] sm:$0xff] %v2563_v39  ;;  %v2564_v45 = vadd.f32 0.5, %v2536_v40  ;;  %v2542_v46 = vmul.f32 0.5, %v3493_v41 }
 0x723   : > { %v3497_v48 = vpop.eup %3496  ;;  %2590 = vst [vmem:[%s4483_s16 + $0x78] sm:$0xff] %v2562_v42  ;;  %v2568_v49 = vadd.f32 0.5, %v2540_v43  ;;  %v2541_v50 = vmul.f32 0.5, %v3495_v44 }
 0x724   : > { %2592 = vst [vmem:[%s4483_s16 + $0x88] sm:$0xff] %v2564_v45  ;;  %v2570_v52 = vadd.f32 0.5, %v2542_v46  ;;  %v2543_v53 = vmul.f32 0.5, %v3497_v48 }
 0x725   : > { %2596 = vst [vmem:[%s4483_s16 + $0xa8] sm:$0xff] %v2568_v49  ;;  %v2569_v54 = vadd.f32 0.5, %v2541_v50  ;;  %v2395_v55 = vpop.f32.mrb[32].mxu0  ;;  %v3187_v56 = vpop.f32.mrb[32].mxu1 }
 0x726   : > { %2598 = vst [vmem:[%s4483_s16 + $0xb8] sm:$0xff] %v2570_v52  ;;  %v2571_v57 = vadd.f32 0.5, %v2543_v53  ;;  %v2396_v58 = vadd.f32 %v2395_v55, %v1951_v47  ;;  %v2457_v59 = vadd.f32 %v3187_v56, %v1959_v7  ;;  %v2397_v60 = vpop.f32.mrb[33].mxu0  ;;  %v2448_v61 = vpop.f32.mrb[33].mxu1 }
 0x727   : > { %2597 = vst [vmem:[%s4483_s16 + $0xb0] sm:$0xff] %v2569_v54  ;;  %v2398_v62 = vadd.f32 %v2397_v60, %v1955_v51  ;;  %v2449_v63 = vadd.f32 %v2448_v61, %v1959_v7  ;;  %v2399_v0 = vpop.f32.mrb[34].mxu0  ;;  %v3188_v1 = vpop.f32.mrb[34].mxu1 }
 0x728   : > { %2599 = vst [vmem:[%s4483_s16 + $0xc0] sm:$0xff] %v2571_v57  ;;  %v2467_v10 = vmul.f32 0.5, %v2396_v58  ;;  %v2483_v2 = vmul.f32 0.5, %v2457_v59  ;;  %v2400_v3 = vadd.f32 %v2399_v0, %v1951_v47  ;;  %v2460_v4 = vadd.f32 %v3188_v1, %v1959_v7  ;;  %v2401_v5 = vpop.f32.mrb[35].mxu0  ;;  %v2451_v6 = vpop.f32.mrb[35].mxu1 }
 0x729   : > { %v2468_v8 = vmul.f32 0.5, %v2398_v62  ;;  %v2469_v9 = vmul.f32 0.5, %v2449_v63  ;;  %v2402_v11 = vadd.f32 %v2401_v5, %v1955_v51  ;;  %v2452_v12 = vadd.f32 %v2451_v6, %v1959_v7 }
 0x72a   : > { %3498 = vtanh.f32 %v2467_v10  ;;  %v2474_v13 = vmul.f32 0.5, %v2400_v3  ;;  %v2490_v14 = vmul.f32 0.5, %v2460_v4 }
 0x72b   : > { %3500 = vtanh.f32 %v2483_v2  ;;  %v2475_v15 = vmul.f32 0.5, %v2402_v11  ;;  %v2476_v16 = vmul.f32 0.5, %v2452_v12 }
 0x72c   : > { %3502 = vtanh.f32 %v2468_v8 }
 0x72d   : > { %3504 = vtanh.f32 %v2469_v9  ;;  %v2405_v17 = vpop.f32.mrb[36].mxu0 }
 0x72e   : > { %3506 = vtanh.f32 %v2474_v13  ;;  %v2406_v18 = vadd.f32 %v2405_v17, %v1951_v47  ;;  %v2407_v19 = vpop.f32.mrb[37].mxu0 }
 0x72f   : > { %3508 = vtanh.f32 %v2490_v14  ;;  %v2408_v20 = vadd.f32 %v2407_v19, %v1955_v51  ;;  %v2409_v21 = vpop.f32.mrb[38].mxu0 }
 0x730   : > { %3510 = vtanh.f32 %v2475_v15  ;;  %v2481_v22 = vmul.f32 0.5, %v2406_v18  ;;  %v2410_v23 = vadd.f32 %v2409_v21, %v1951_v47  ;;  %v2411_v24 = vpop.f32.mrb[39].mxu0 }
 0x731   : > { %3512 = vtanh.f32 %v2476_v16  ;;  %v2482_v25 = vmul.f32 0.5, %v2408_v20  ;;  %v2412_v26 = vadd.f32 %v2411_v24, %v1955_v51 }
 0x732   : > { %3514 = vtanh.f32 %v2481_v22  ;;  %v2488_v27 = vmul.f32 0.5, %v2410_v23 }
 0x733   : > { %3516 = vtanh.f32 %v2482_v25  ;;  %v2489_v28 = vmul.f32 0.5, %v2412_v26 }
 0x734   : > { %v3499_v29 = vpop.eup %3498  ;;  %3518 = vtanh.f32 %v2488_v27 }
 0x735   : > { %v3501_v30 = vpop.eup %3500  ;;  %v2523_v31 = vmul.f32 0.5, %v3499_v29  ;;  %3520 = vtanh.f32 %v2489_v28 }
 0x736   : > { %v3503_v32 = vpop.eup %3502  ;;  %v2539_v33 = vmul.f32 0.5, %v3501_v30 }
 0x737   : > { %v3505_v34 = vpop.eup %3504  ;;  %v2551_v35 = vadd.f32 0.5, %v2523_v31  ;;  %v2524_v36 = vmul.f32 0.5, %v3503_v32 }
 0x738   : > { %v3507_v37 = vpop.eup %3506  ;;  %v2567_v38 = vadd.f32 0.5, %v2539_v33  ;;  %v2525_v39 = vmul.f32 0.5, %v3505_v34 }
 0x739   : > { %v3509_v40 = vpop.eup %3508  ;;  %2579 = vst [vmem:[%s4483_s16 + $0x20] sm:$0xff] %v2551_v35  ;;  %v2552_v41 = vadd.f32 0.5, %v2524_v36  ;;  %v2530_v42 = vmul.f32 0.5, %v3507_v37 }
 0x73a   : > { %v3511_v43 = vpop.eup %3510  ;;  %2595 = vst.msk [vmem:[%s4483_s16 + $0xa0] sm:$0xff] %vm1027_vm0, %v2567_v38  ;;  %v2553_v44 = vadd.f32 0.5, %v2525_v39  ;;  %v2546_v45 = vmul.f32 0.5, %v3509_v40 }
 0x73b   : > { %v3513_v46 = vpop.eup %3512  ;;  %2580 = vst [vmem:[%s4483_s16 + $0x28] sm:$0xff] %v2552_v41  ;;  %v2558_v47 = vadd.f32 0.5, %v2530_v42  ;;  %v2531_v7 = vmul.f32 0.5, %v3511_v43 }
 0x73c   : > { %v3515_v48 = vpop.eup %3514  ;;  %2581 = vst.msk [vmem:[%s4483_s16 + $0x30] sm:$0xff] %vm1027_vm0, %v2553_v44  ;;  %v2574_v49 = vadd.f32 0.5, %v2546_v45  ;;  %v2532_v50 = vmul.f32 0.5, %v3513_v46 }
 0x73d   : > { %v3517_v51 = vpop.eup %3516  ;;  %2586 = vst [vmem:[%s4483_s16 + $0x58] sm:$0xff] %v2558_v47  ;;  %v2559_v52 = vadd.f32 0.5, %v2531_v7  ;;  %v2537_v53 = vmul.f32 0.5, %v3515_v48 }
 0x73e   : > { %v3519_v54 = vpop.eup %3518  ;;  %2602 = vst.msk [vmem:[%s4483_s16 + $0xd8] sm:$0xff] %vm1027_vm0, %v2574_v49  ;;  %v2560_v55 = vadd.f32 0.5, %v2532_v50  ;;  %v2538_v56 = vmul.f32 0.5, %v3517_v51 }
 0x73f   : > { %v3521_v57 = vpop.eup %3520  ;;  %2587 = vst [vmem:[%s4483_s16 + $0x60] sm:$0xff] %v2559_v52  ;;  %v2565_v58 = vadd.f32 0.5, %v2537_v53  ;;  %v2544_v59 = vmul.f32 0.5, %v3519_v54 }
 0x740   : > { %2588 = vst.msk [vmem:[%s4483_s16 + $0x68] sm:$0xff] %vm1027_vm0, %v2560_v55  ;;  %v2566_v60 = vadd.f32 0.5, %v2538_v56  ;;  %v2545_v61 = vmul.f32 0.5, %v3521_v57 }
 0x741   : > { %2593 = vst [vmem:[%s4483_s16 + $0x90] sm:$0xff] %v2565_v58  ;;  %v2572_v62 = vadd.f32 0.5, %v2544_v59 }
 0x742   : > { %2594 = vst [vmem:[%s4483_s16 + $0x98] sm:$0xff] %v2566_v60  ;;  %v2573_v63 = vadd.f32 0.5, %v2545_v61 }
 0x743   : > { %2600 = vst [vmem:[%s4483_s16 + $0xc8] sm:$0xff] %v2572_v62 }
 0x744   : > { %2601 = vst [vmem:[%s4483_s16 + $0xd0] sm:$0xff] %v2573_v63 }
 0x745   : > { %3703 = shalt.err (!%p3700_p2)
}
 0x746   : > { %s3704_s27 = scalar_lea.hbm %s4528_s24, 3584  ;;  %s3708_s17 = scalar_lea.hbm %s4637_s23, 7168 }
 0x747   : > { %p3705_p3 = scmp.ne.s32.totalorder %s4528_s24, %s3704_s27  ;;  %p3709_p7 = scmp.lt.u32.totalorder %s4528_s24, %s4637_s23 }
 0x748   : > { %p3710_p8 = scmp.lt.u32.totalorder %s3708_s17, %s3704_s27  ;;  %p3712_p13 = scmp.lt.u32.totalorder %s3704_s27, %s4528_s24 }
 0x749   : > { %p3706_p4 = pnand %p3705_p3, %p4638_p1 }
 0x74a   : > { %p3711_p11 = por %p3710_p8, %p3709_p7 }
 0x74b   : > { %p3707_p12 = pneg %p3706_p4 }
 0x74c   : > { %p3713_p6 = por %p3712_p13, %p3711_p11 }
 0x74e   : > { %p3714_p9 = pnand %p3713_p6, %p3707_p12 }
 0x750   : > { %3717 = shalt.err (!%p3714_p9)
}
 0x751   : > { %s3780_s28 = smov 896   ;;  %s3781_s22 = smov 56  }
 0x752   : > { %3216 = dma.vmem_to_hbm [thread:$0]  (%p4638_p1), %s4522_s21, 3584, %s4528_s24, %s4534_s12, %s3780_s28, %s3780_s28, %s3781_s22  }
 0x753 PF: > { %s4639_s30 = sld [smem:[#allocation22_spill]]  ;;  %s4640_s14 = sld [smem:[#allocation19_spill]] }
 0x754   : > { %s4641_s19 = sld [smem:[#allocation26_spill]] }
 0x759   : > { %p3253_p5 = scmp.ge.s32.totalorder %s4639_s30, 2  ;;  %s2633_s29 = sand.u32 1, %s4640_s14  }
 0x75a   : > { %p4642_p0 = scmp.ne.s32.totalorder %s4641_s19, 0  ;;  %s2634_s25 = scalar_lea.sflag [#allocation4], %s2633_s29 }
 0x75c   : > { %p3238_p10 = pnand %p3253_p5, %p4642_p0 }
 0x75e   : > { %3751 = dma.done.wait (!%p3238_p10), %s2634_s25, 3584  }
 0x75f   : > { %3753 = vsyncadd (!%p3238_p10), %s2634_s25, 4294963712  ;;  %s4643_s21 = sld [smem:[#allocation23_spill]]  ;;  %s4644_s18 = sld [smem:[#allocation20_spill]] }
 0x760   : > { %s4645_s19 = sld [smem:[#allocation21_spill]]  ;;  %s4646_s20 = sld [smem:[#allocation24_spill]] }
 0x765   : > { %p29_p2 = scmp.ge.s32.totalorder %s4643_s21, 4  }
 0x767   :  { %31 = sbr.rel (!%p29_p2) target bundleno = 11 (0xb), region = 140 }
 0x76e   :  { %2639 = vsyncpa [#allocation3], 1 }
 0x76f   :  { %2641 = vsyncpa [#allocation3 + $0x1], 1 }
 0x770   :  { %2642 = vsyncpa [#allocation6], 1 }
 0x771   :  { %2643 = vsyncpa [#allocation9], 1 }
 0x772   :  { %2644 = vsyncpa [#allocation12], 1 }
 0x773   :  { %2645 = vsyncpa [#allocation4], 1 }
 0x774   :  { %2647 = vsyncpa [#allocation4 + $0x1], 1 }

</bundles_post_ra>
